<compile_context>
chip_gen: v7x
topology: tpu7x:2x2x1
jax: 0.10.0
libtpu: 0.0.40
codegen_flags: <defaults>
</compile_context>

<pallas_src>
import math
import functools

import jax
import jax.numpy as jnp
from jax.experimental import pallas as pl
from jax.experimental.pallas import tpu as pltpu


# ----------------------------- per-generation sizing -----------------------------

def _tpu_vmem_bytes():
    try:
        info = pltpu.get_tpu_info()
        for attr in ("vmem_capacity_bytes", "vmem_size_bytes", "vmem_bytes"):
            v = getattr(info, attr, None)
            if v:
                return int(v)
    except Exception:
        pass
    return 64 * 1024 * 1024  # conservative (v7x-sized) fallback


_VMEM_PHYS = _tpu_vmem_bytes()
_VMEM_LIMIT = (_VMEM_PHYS * 3) // 4                 # ~48 MiB on v7x, ~96 MiB on v5e/v6e
_BIG_TILES = _VMEM_LIMIT >= 80 * 1024 * 1024        # 512-wide tiles only on 128 MiB parts
_RESIDENT_W_BYTES = min(16 * 1024 * 1024, _VMEM_LIMIT // 4)


def _pick_tile(dim, target, align):
    """Largest tile <= target that divides dim and is a multiple of `align`.
    Falls back to the full dim (always legal: block == full array dim).
    NOTE: for awkward dims this can return a large full-dim block; the callers'
    VMEM budget checks route such cases to a smaller-footprint path."""
    if dim <= target:
        return dim
    t = (target // align) * align
    while t >= align:
        if dim % t == 0:
            return t
        t -= align
    return dim


def _row_tile(M, x_itemsize):
    # bf16 packs 16 rows per sublane vreg -> 16-aligned row tiles for bf16 inputs.
    align = 16 if x_itemsize == 2 else 8
    return _pick_tile(M, 512 if _BIG_TILES else 256, align)


# ----------------------------- linear kernels -----------------------------

def _linear_nok_kernel(x_ref, w_ref, b_ref, o_ref, *, relu):
    # Single-pass over K (no accumulator); weight block is either the whole
    # (K, N) resident weight or a (K, tn) column panel.
    y = jnp.dot(x_ref[...].astype(w_ref.dtype), w_ref[...],
                preferred_element_type=jnp.float32)
    y = y + b_ref[...]
    if relu:
        y = jnp.maximum(y, 0.0)
    o_ref[...] = y.astype(o_ref.dtype)


def _linear_ktiled_kernel(x_ref, w_ref, b_ref, o_ref, acc_ref, *, relu):
    k = pl.program_id(2)

    @pl.when(k == 0)
    def _init():
        acc_ref[...] = jnp.zeros_like(acc_ref)

    acc_ref[...] += jnp.dot(x_ref[...].astype(w_ref.dtype), w_ref[...],
                            preferred_element_type=jnp.float32)

    @pl.when(k == pl.num_programs(2) - 1)
    def _finalize():
        y = acc_ref[...] + b_ref[...]
        if relu:
            y = jnp.maximum(y, 0.0)
        o_ref[...] = y.astype(o_ref.dtype)


def linear(x, w_t, b, *, relu=False, out_dtype=jnp.float32):
    """y = x @ w_t + b  (w_t is the PyTorch weight transposed: (K, N), bf16)."""
    M, K = x.shape
    N = w_t.shape[1]
    xb, wb = x.dtype.itemsize, w_t.dtype.itemsize
    ob = jnp.dtype(out_dtype).itemsize
    tm = _row_tile(M, xb)
    b2 = b.reshape(1, N)
    cost = pl.CostEstimate(flops=2 * M * K * N, transcendentals=0,
                           bytes_accessed=int(M * K * xb + K * N * wb + M * N * ob + N * 4))
    kern = functools.partial(_linear_nok_kernel, relu=relu)

    # Path 1: whole (K, N) weight VMEM-resident across all row tiles (constant
    # index_map -> DMA'd once), single pass over K, no accumulator.
    if (K * N * wb <= _RESIDENT_W_BYTES
            and 2 * K * N * wb + 2 * tm * (K * xb + N * ob) + 2 * N * 4 <= _VMEM_LIMIT):
        return pl.pallas_call(
            kern,
            out_shape=jax.ShapeDtypeStruct((M, N), out_dtype),
            grid=(M // tm,),
            in_specs=[pl.BlockSpec((tm, K), lambda i: (i, 0)),
                      pl.BlockSpec((K, N), lambda i: (0, 0)),     # resident weight
                      pl.BlockSpec((1, N), lambda i: (0, 0))],
            out_specs=pl.BlockSpec((tm, N), lambda i: (i, 0)),
            compiler_params=pltpu.CompilerParams(
                dimension_semantics=("parallel",),
                vmem_limit_bytes=_VMEM_LIMIT),
            cost_estimate=cost,
        )(x, w_t, b2)

    # Path 2: full-K single pass, N tiled (vocab projection). The x row panel is
    # j-independent so it is fetched once per i instead of once per (i, j).
    tn = _pick_tile(N, 512 if _BIG_TILES else 256, 128)
    if 2 * tm * K * xb + 2 * K * tn * wb + 2 * tm * tn * ob + 2 * tn * 4 <= _VMEM_LIMIT:
        return pl.pallas_call(
            kern,
            out_shape=jax.ShapeDtypeStruct((M, N), out_dtype),
            grid=(M // tm, N // tn),
            in_specs=[pl.BlockSpec((tm, K), lambda i, j: (i, 0)),
                      pl.BlockSpec((K, tn), lambda i, j: (0, j)),
                      pl.BlockSpec((1, tn), lambda i, j: (0, j))],
            out_specs=pl.BlockSpec((tm, tn), lambda i, j: (i, j)),
            compiler_params=pltpu.CompilerParams(
                dimension_semantics=("parallel", "parallel"),
                vmem_limit_bytes=_VMEM_LIMIT),
            cost_estimate=cost,
        )(x, w_t, b2)

    # Path 3: k-tiled fallback with an f32 accumulator (very large K).
    tn = _pick_tile(N, 512 if _BIG_TILES else 256, 128)
    tk = _pick_tile(K, 512, 128)
    return pl.pallas_call(
        functools.partial(_linear_ktiled_kernel, relu=relu),
        out_shape=jax.ShapeDtypeStruct((M, N), out_dtype),
        grid=(M // tm, N // tn, K // tk),
        in_specs=[pl.BlockSpec((tm, tk), lambda i, j, k: (i, k)),
                  pl.BlockSpec((tk, tn), lambda i, j, k: (k, j)),
                  pl.BlockSpec((1, tn), lambda i, j, k: (0, j))],
        out_specs=pl.BlockSpec((tm, tn), lambda i, j, k: (i, j)),
        scratch_shapes=[pltpu.VMEM((tm, tn), jnp.float32)],
        compiler_params=pltpu.CompilerParams(
            dimension_semantics=("parallel", "parallel", "arbitrary"),
            vmem_limit_bytes=_VMEM_LIMIT),
        cost_estimate=cost,
    )(x, w_t, b2)


# ----------------------------- fused matmul + residual add + LayerNorm -----------------------------

def _linear_add_ln_kernel(x_ref, w_ref, b_ref, r_ref, g_ref, bb_ref, o_ref, *, eps):
    # Single-pass fused GEMM + residual add + LayerNorm (resident weight).
    y = jnp.dot(x_ref[...].astype(w_ref.dtype), w_ref[...],
                preferred_element_type=jnp.float32)
    y = y + b_ref[...] + r_ref[...]
    mean = jnp.mean(y, axis=-1, keepdims=True)
    var = jnp.mean(jnp.square(y - mean), axis=-1, keepdims=True)
    o_ref[...] = ((y - mean) * jax.lax.rsqrt(var + eps) * g_ref[...]
                  + bb_ref[...]).astype(o_ref.dtype)


def _linear_add_ln_ktiled_kernel(x_ref, w_ref, b_ref, r_ref, g_ref, bb_ref,
                                 o_ref, acc_ref, *, eps):
    k = pl.program_id(1)

    @pl.when(k == 0)
    def _init():
        acc_ref[...] = jnp.zeros_like(acc_ref)

    acc_ref[...] += jnp.dot(x_ref[...].astype(w_ref.dtype), w_ref[...],
                            preferred_element_type=jnp.float32)

    @pl.when(k == pl.num_programs(1) - 1)
    def _finalize():
        y = acc_ref[...] + b_ref[...] + r_ref[...]
        mean = jnp.mean(y, axis=-1, keepdims=True)
        var = jnp.mean(jnp.square(y - mean), axis=-1, keepdims=True)
        o_ref[...] = ((y - mean) * jax.lax.rsqrt(var + eps) * g_ref[...]
                      + bb_ref[...]).astype(o_ref.dtype)


def linear_add_layernorm(x, w_t, b, resid, gamma, beta, eps=1e-5):
    """LayerNorm(x @ w_t + b + resid) over the last axis. Output is f32 (residual stream)."""
    M, K = x.shape
    N = w_t.shape[1]
    xb, wb = x.dtype.itemsize, w_t.dtype.itemsize
    tm = _row_tile(M, xb)
    args = (x, w_t, b.reshape(1, N), resid, gamma.reshape(1, N), beta.reshape(1, N))
    cost = pl.CostEstimate(flops=2 * M * K * N + 10 * M * N, transcendentals=M,
                           bytes_accessed=int(M * K * xb + K * N * wb + 2 * M * N * 4 + 3 * N * 4))

    # Resident weight, single pass over K (no k grid axis, no accumulator).
    if (K * N * wb <= _RESIDENT_W_BYTES
            and 2 * K * N * wb + 2 * tm * (K * xb + 2 * N * 4) + 6 * N * 4 <= _VMEM_LIMIT):
        return pl.pallas_call(
            functools.partial(_linear_add_ln_kernel, eps=eps),
            out_shape=jax.ShapeDtypeStruct((M, N), jnp.float32),
            grid=(M // tm,),
            in_specs=[pl.BlockSpec((tm, K), lambda i: (i, 0)),
                      pl.BlockSpec((K, N), lambda i: (0, 0)),     # resident weight
                      pl.BlockSpec((1, N), lambda i: (0, 0)),
                      pl.BlockSpec((tm, N), lambda i: (i, 0)),
                      pl.BlockSpec((1, N), lambda i: (0, 0)),
                      pl.BlockSpec((1, N), lambda i: (0, 0))],
            out_specs=pl.BlockSpec((tm, N), lambda i: (i, 0)),
            compiler_params=pltpu.CompilerParams(
                dimension_semantics=("parallel",),
                vmem_limit_bytes=_VMEM_LIMIT),
            cost_estimate=cost,
        )(*args)

    # Fallback: tile K with an f32 accumulator (weight too large for residency).
    tk = _pick_tile(K, 512, 128)
    return pl.pallas_call(
        functools.partial(_linear_add_ln_ktiled_kernel, eps=eps),
        out_shape=jax.ShapeDtypeStruct((M, N), jnp.float32),
        grid=(M // tm, K // tk),
        in_specs=[pl.BlockSpec((tm, tk), lambda i, k: (i, k)),
                  pl.BlockSpec((tk, N), lambda i, k: (k, 0)),
                  pl.BlockSpec((1, N), lambda i, k: (0, 0)),
                  pl.BlockSpec((tm, N), lambda i, k: (i, 0)),
                  pl.BlockSpec((1, N), lambda i, k: (0, 0)),
                  pl.BlockSpec((1, N), lambda i, k: (0, 0))],
        out_specs=pl.BlockSpec((tm, N), lambda i, k: (i, 0)),
        scratch_shapes=[pltpu.VMEM((tm, N), jnp.float32)],
        compiler_params=pltpu.CompilerParams(
            dimension_semantics=("parallel", "arbitrary"),
            vmem_limit_bytes=_VMEM_LIMIT),
        cost_estimate=cost,
    )(*args)


# ----------------------------- multi-head attention -----------------------------

def _attn_kernel(q_ref, k_ref, v_ref, o_ref):
    S, Hb, Dh = q_ref.shape
    q = q_ref[...]                                  # (S, Hb, Dh) bf16 -- no in-kernel casts
    k = k_ref[...]
    v = v_ref[...]
    # Causal mask built in-kernel with iota: no (S,S) HBM mask input / VMEM block.
    row = jax.lax.broadcasted_iota(jnp.int32, (S, S), 0)
    col = jax.lax.broadcasted_iota(jnp.int32, (S, S), 1)
    causal = col <= row
    # TODO(synk): a head-batched dot_general + single lane-dense (S, Hb*Dh) store
    # would further cut XLU/vst work, but needs (Hb,S,Dh)<->(S,Hb*Dh) in-kernel
    # relayouts that Mosaic does not robustly support; Hb is sized (below) so the
    # per-head (S,S) f32 intermediates fit the per-generation VMEM budget.
    for h in range(Hb):                             # static unroll over heads in this block
        qh = q[:, h, :]
        kh = k[:, h, :]
        vh = v[:, h, :]
        # 1/sqrt(Dh) is folded into the Q projection weights.
        s = jnp.dot(qh, kh.T, preferred_element_type=jnp.float32)
        s = jnp.where(causal, s, -jnp.inf)          # safe: diagonal always allowed
        mx = jnp.max(s, axis=-1, keepdims=True)
        p = jnp.exp(s - mx)
        denom = jnp.sum(p, axis=-1, keepdims=True)
        o = jnp.dot(p.astype(vh.dtype), vh, preferred_element_type=jnp.float32)
        # approx reciprocal runs on the EUP slot; ~1e-4 rel deviation from exact softmax.
        o_ref[:, h, :] = (o * pl.reciprocal(denom, approx=True)).astype(o_ref.dtype)


def _heads_per_block(H, S, Dh, budget):
    # Block second-minor dim must be a multiple of 8 or the full head dim.
    cands = {H}
    if H % 8 == 0:
        cands.add(8)
        if H % 16 == 0:
            cands.add(16)

    def footprint(hb):
        # worst-case live f32 score/prob tensors + double-buffered bf16 q/k/v/out blocks
        return 3 * hb * S * S * 4 + 8 * S * hb * Dh * 2

    fitting = sorted(h for h in cands if footprint(h) <= budget // 2)
    if fitting:
        return fitting[0]   # smallest fitting block also maximizes grid parallelism
    # TODO(synk): flash-style KV-tiled online softmax for very long S.
    return min(cands)


def mha_attention(qkv, out_dtype=jnp.bfloat16):
    """qkv: (S, B, 3, H, Dh) bf16 (Q/K/V selected purely via BlockSpecs).
    Returns (S, B, H, Dh) attention output (pre out-projection)."""
    S, B, three, H, Dh = qkv.shape
    assert three == 3
    Hb = _heads_per_block(H, S, Dh, _VMEM_LIMIT)
    grid = (B, H // Hb)

    def qkv_spec(sel):
        # `None` dims are size-1 and squeezed out of the kernel ref.
        return pl.BlockSpec((S, None, None, Hb, Dh),
                            lambda b, h, sel=sel: (0, b, sel, h, 0))

    return pl.pallas_call(
        _attn_kernel,
        out_shape=jax.ShapeDtypeStruct((S, B, H, Dh), out_dtype),
        grid=grid,
        in_specs=[qkv_spec(0), qkv_spec(1), qkv_spec(2)],
        out_specs=pl.BlockSpec((S, None, Hb, Dh), lambda b, h: (0, b, h, 0)),
        compiler_params=pltpu.CompilerParams(
            dimension_semantics=("parallel", "parallel"),
            vmem_limit_bytes=_VMEM_LIMIT),
    )(qkv, qkv, qkv)


# ----------------------------- embedding scale + positional encoding -----------------------------

def _scale_pe_kernel(e_ref, pe_ref, o_ref, *, scale):
    # pe block is (ts, 1, E) and broadcasts over the batch dim inside the kernel.
    o_ref[...] = (e_ref[...] * scale + pe_ref[...]).astype(o_ref.dtype)


def scale_add_pe(emb, pe, scale, ts=256):
    """emb * sqrt(ninp) + positional encoding.  emb: (S, B, E), pe: (S, E). f32 out (residual)."""
    S, B, E = emb.shape
    ts = _pick_tile(S, ts, 8)
    return pl.pallas_call(
        functools.partial(_scale_pe_kernel, scale=scale),
        out_shape=jax.ShapeDtypeStruct((S, B, E), jnp.float32),
        grid=(S // ts,),
        in_specs=[pl.BlockSpec((ts, B, E), lambda i: (i, 0, 0)),
                  pl.BlockSpec((ts, 1, E), lambda i: (i, 0, 0))],
        out_specs=pl.BlockSpec((ts, B, E), lambda i: (i, 0, 0)),
        compiler_params=pltpu.CompilerParams(
            dimension_semantics=("parallel",),
            vmem_limit_bytes=_VMEM_LIMIT),
    )(emb, pe[:, None, :])


# ----------------------------- model glue -----------------------------

def make_positional_encoding(max_len, d_model):
    position = jnp.arange(max_len, dtype=jnp.float32)[:, None]
    div_term = jnp.exp(jnp.arange(0, d_model, 2, dtype=jnp.float32)
                       * (-math.log(10000.0) / d_model))
    pe = jnp.zeros((max_len, d_model), dtype=jnp.float32)
    pe = pe.at[:, 0::2].set(jnp.sin(position * div_term))
    pe = pe.at[:, 1::2].set(jnp.cos(position * div_term))
    return pe  # (max_len, d_model)


def init_params(key, ntoken, ninp, nhead, nhid, nlayers, max_len=5000):
    keys = jax.random.split(key, 2 + nlayers)
    initrange = 0.1
    dh = ninp // nhead
    q_scale = 1.0 / math.sqrt(dh)

    def u(k, shape, scale):
        return jax.random.uniform(k, shape, jnp.float32, -scale, scale)

    params = {
        'emb': u(keys[0], (ntoken, ninp), initrange),
        'pe': make_positional_encoding(max_len, ninp),
        'dec_w_t': u(keys[1], (ninp, ntoken), initrange).astype(jnp.bfloat16),
        'dec_b': jnp.zeros((ntoken,), jnp.float32),
        'layers': [],
    }
    for l in range(nlayers):
        lk = jax.random.split(keys[2 + l], 6)
        in_w = u(lk[0], (ninp, 3 * ninp), 1.0 / math.sqrt(ninp))
        in_b = jnp.zeros((3 * ninp,), jnp.float32)
        # Fold the 1/sqrt(Dh) attention scale into the Q projection; softmax(QK^T/sqrt(Dh)) unchanged.
        in_w = in_w.at[:, :ninp].multiply(q_scale)
        in_b = in_b.at[:ninp].multiply(q_scale)
        params['layers'].append(dict(
            in_w_t=in_w.astype(jnp.bfloat16),
            in_b=in_b,
            out_w_t=u(lk[1], (ninp, ninp), 1.0 / math.sqrt(ninp)).astype(jnp.bfloat16),
            out_b=jnp.zeros((ninp,), jnp.float32),
            ln1_g=jnp.ones((ninp,), jnp.float32),
            ln1_b=jnp.zeros((ninp,), jnp.float32),
            lin1_w_t=u(lk[2], (ninp, nhid), 1.0 / math.sqrt(ninp)).astype(jnp.bfloat16),
            lin1_b=u(lk[3], (nhid,), 1.0 / math.sqrt(ninp)),
            lin2_w_t=u(lk[4], (nhid, ninp), 1.0 / math.sqrt(nhid)).astype(jnp.bfloat16),
            lin2_b=u(lk[5], (ninp,), 1.0 / math.sqrt(nhid)),
            ln2_g=jnp.ones((ninp,), jnp.float32),
            ln2_b=jnp.zeros((ninp,), jnp.float32),
        ))
    return params


def transformer_forward(params, tokens, *, nhead):
    """Causal transformer encoder LM (the standard square-subsequent mask is
    generated inside the attention kernel; arbitrary additive masks would need
    to be passed back in as a kernel input)."""
    S, B = tokens.shape
    E = params['emb'].shape[1]
    Dh = E // nhead

    # Embedding gather (XLA glue), then scale + positional encoding (kernel).
    emb = jnp.take(params['emb'], tokens, axis=0)                  # (S, B, E) f32
    x = scale_add_pe(emb, params['pe'][:S], math.sqrt(E))          # (S, B, E) f32 residual

    for lp in params['layers']:
        x2d = x.reshape(S * B, E)

        # --- self attention block ---
        qkv = linear(x2d, lp['in_w_t'], lp['in_b'],
                     out_dtype=jnp.bfloat16)                       # (S*B, 3E) bf16
        qkv5 = qkv.reshape(S, B, 3, nhead, Dh)                     # pure reshape, no split copies
        attn = mha_attention(qkv5)                                 # (S, B, H, Dh) bf16
        attn2d = attn.reshape(S * B, E)                            # pure reshape
        # fused: out_proj + residual add + LayerNorm  (f32 residual out)
        x2d = linear_add_layernorm(attn2d, lp['out_w_t'], lp['out_b'],
                                   x2d, lp['ln1_g'], lp['ln1_b'])

        # --- feed-forward block ---
        h = linear(x2d, lp['lin1_w_t'], lp['lin1_b'], relu=True,
                   out_dtype=jnp.bfloat16)                         # (S*B, nhid) bf16
        # fused: lin2 + residual add + LayerNorm  (f32 residual out)
        x2d = linear_add_layernorm(h, lp['lin2_w_t'], lp['lin2_b'],
                                   x2d, lp['ln2_g'], lp['ln2_b'])

        x = x2d.reshape(S, B, E)

    logits = linear(x.reshape(S * B, E), params['dec_w_t'], params['dec_b'],
                    out_dtype=jnp.float32)                         # logits stay f32
    return logits.reshape(S, B, -1)                                # (S, B, ntoken)


# ----------------------------- main -----------------------------

if __name__ == "__main__":
    ntoken, ninp, nhead, nhid, nlayers = 32, 32, 4, 64, 2
    S, B = 8, 2

    key = jax.random.PRNGKey(0)
    pkey, tkey = jax.random.split(key)

    params = init_params(pkey, ntoken, ninp, nhead, nhid, nlayers)
    tokens = jax.random.randint(tkey, (S, B), 0, ntoken)           # src: (S, B) int ids

    fwd = jax.jit(functools.partial(transformer_forward, nhead=nhead))
    out = jax.block_until_ready(fwd(params, tokens))

    assert out.shape == (S, B, ntoken), out.shape
    assert bool(jnp.all(jnp.isfinite(out)))
    print("KERNEL_OK")
</pallas_src>

<mosaic_0001>
module attributes {stable_mosaic.version = 11 : i64} {
  func.func @_linear_nok_kernel(%arg0: i32, %arg1: memref<16x32xf32, #tpu.memory_space<vmem>>, %arg2: memref<32x96xbf16, #tpu.memory_space<vmem>>, %arg3: memref<1x96xf32, #tpu.memory_space<vmem>>, %arg4: memref<16x96xbf16, #tpu.memory_space<vmem>>) attributes {dimension_semantics = [#tpu.dimension_semantics<parallel>], iteration_bounds = array<i64: 1>, scalar_prefetch = 0 : i64, scratch_operands = 0 : i64, tpu.core_type = #tpu.core_type<tc>, window_params = [{transform_indices = @transform_0, window_bounds = array<i64: 16, 32>}, {pipeline_mode = #tpu.pipeline_mode<synchronous>, transform_indices = @transform_1, window_bounds = array<i64: 32, 96>}, {pipeline_mode = #tpu.pipeline_mode<synchronous>, transform_indices = @transform_2, window_bounds = array<i64: 1, 96>}, {transform_indices = @transform_3, window_bounds = array<i64: 16, 96>}]} {
    %c0 = arith.constant 0 : index
    %c0_0 = arith.constant 0 : index
    %0 = vector.load %arg1[%c0, %c0_0] : memref<16x32xf32, #tpu.memory_space<vmem>>, vector<16x32xf32>
    %1 = arith.truncf %0 : vector<16x32xf32> to vector<16x32xbf16>
    %c0_1 = arith.constant 0 : index
    %c0_2 = arith.constant 0 : index
    %2 = vector.load %arg2[%c0_1, %c0_2] : memref<32x96xbf16, #tpu.memory_space<vmem>>, vector<32x96xbf16>
    %cst = arith.constant dense<0.000000e+00> : vector<16x96xf32>
    %3 = tpu.matmul %1, %2, %cst {dimension_numbers = #tpu.dot_dimension_numbers<[1], [0], [0], [1], [0, 0, 1, 1], [], []>} : vector<16x32xbf16>, vector<32x96xbf16>, vector<16x96xf32> -> vector<16x96xf32>
    %c0_3 = arith.constant 0 : index
    %c0_4 = arith.constant 0 : index
    %4 = vector.load %arg3[%c0_3, %c0_4] : memref<1x96xf32, #tpu.memory_space<vmem>>, vector<1x96xf32>
    %5 = vector.broadcast %4 : vector<1x96xf32> to vector<16x96xf32>
    %6 = arith.addf %3, %5 : vector<16x96xf32>
    %7 = arith.truncf %6 : vector<16x96xf32> to vector<16x96xbf16>
    %c0_5 = arith.constant 0 : index
    %c0_6 = arith.constant 0 : index
    %8 = vector.load %arg4[%c0_5, %c0_6] : memref<16x96xbf16, #tpu.memory_space<vmem>>, vector<16x96xbf16>
    tpu.vector_store %arg4[%c0_5, %c0_6], %7 {strides = array<i32>} : memref<16x96xbf16, #tpu.memory_space<vmem>>, vector<16x96xbf16>,
    return
  }
  func.func @transform_0(%arg0: i32) -> (i32, i32) {
    %c0_i32 = arith.constant 0 : i32
    %c0_i32_0 = arith.constant 0 : i32
    return %arg0, %c0_i32 : i32, i32
  }
  func.func @transform_1(%arg0: i32) -> (i32, i32) {
    %c0_i32 = arith.constant 0 : i32
    %c0_i32_0 = arith.constant 0 : i32
    %c0_i32_1 = arith.constant 0 : i32
    return %c0_i32, %c0_i32_0 : i32, i32
  }
  func.func @transform_2(%arg0: i32) -> (i32, i32) {
    %c0_i32 = arith.constant 0 : i32
    %c0_i32_0 = arith.constant 0 : i32
    %c0_i32_1 = arith.constant 0 : i32
    return %c0_i32, %c0_i32_0 : i32, i32
  }
  func.func @transform_3(%arg0: i32) -> (i32, i32) {
    %c0_i32 = arith.constant 0 : i32
    %c0_i32_0 = arith.constant 0 : i32
    return %arg0, %c0_i32 : i32, i32
  }
}

module attributes {stable_mosaic.version = 11 : i64} {
  func.func @_scale_pe_kernel(%arg0: i32, %arg1: memref<8x2x32xf32, #tpu.memory_space<vmem>>, %arg2: memref<8x1x32xf32, #tpu.memory_space<vmem>>, %arg3: memref<8x2x32xf32, #tpu.memory_space<vmem>>) attributes {dimension_semantics = [#tpu.dimension_semantics<parallel>], iteration_bounds = array<i64: 1>, scalar_prefetch = 0 : i64, scratch_operands = 0 : i64, tpu.core_type = #tpu.core_type<tc>, window_params = [{transform_indices = @transform_0, window_bounds = array<i64: 8, 2, 32>}, {transform_indices = @transform_1, window_bounds = array<i64: 8, 1, 32>}, {transform_indices = @transform_2, window_bounds = array<i64: 8, 2, 32>}]} {
    %c0 = arith.constant 0 : index
    %c0_0 = arith.constant 0 : index
    %c0_1 = arith.constant 0 : index
    %0 = vector.load %arg1[%c0, %c0_0, %c0_1] : memref<8x2x32xf32, #tpu.memory_space<vmem>>, vector<8x2x32xf32>
    %cst = arith.constant 5.65685415 : f32
    %1 = vector.broadcast %cst : f32 to vector<8x2x32xf32>
    %2 = arith.mulf %0, %1 : vector<8x2x32xf32>
    %c0_2 = arith.constant 0 : index
    %c0_3 = arith.constant 0 : index
    %c0_4 = arith.constant 0 : index
    %3 = vector.load %arg2[%c0_2, %c0_3, %c0_4] : memref<8x1x32xf32, #tpu.memory_space<vmem>>, vector<8x1x32xf32>
    %4 = vector.broadcast %3 : vector<8x1x32xf32> to vector<8x2x32xf32>
    %5 = arith.addf %2, %4 : vector<8x2x32xf32>
    %c0_5 = arith.constant 0 : index
    %c0_6 = arith.constant 0 : index
    %c0_7 = arith.constant 0 : index
    %6 = vector.load %arg3[%c0_5, %c0_6, %c0_7] : memref<8x2x32xf32, #tpu.memory_space<vmem>>, vector<8x2x32xf32>
    tpu.vector_store %arg3[%c0_5, %c0_6, %c0_7], %5 {strides = array<i32>} : memref<8x2x32xf32, #tpu.memory_space<vmem>>, vector<8x2x32xf32>,
    return
  }
  func.func @transform_0(%arg0: i32) -> (i32, i32, i32) {
    %c0_i32 = arith.constant 0 : i32
    %c0_i32_0 = arith.constant 0 : i32
    %c0_i32_1 = arith.constant 0 : i32
    return %arg0, %c0_i32, %c0_i32_0 : i32, i32, i32
  }
  func.func @transform_1(%arg0: i32) -> (i32, i32, i32) {
    %c0_i32 = arith.constant 0 : i32
    %c0_i32_0 = arith.constant 0 : i32
    %c0_i32_1 = arith.constant 0 : i32
    return %arg0, %c0_i32, %c0_i32_0 : i32, i32, i32
  }
  func.func @transform_2(%arg0: i32) -> (i32, i32, i32) {
    %c0_i32 = arith.constant 0 : i32
    %c0_i32_0 = arith.constant 0 : i32
    %c0_i32_1 = arith.constant 0 : i32
    return %arg0, %c0_i32, %c0_i32_0 : i32, i32, i32
  }
}

module attributes {stable_mosaic.version = 11 : i64} {
  func.func @_attn_kernel(%arg0: i32, %arg1: i32, %arg2: memref<8x1x1x4x8xbf16, #tpu.memory_space<vmem>>, %arg3: memref<8x1x1x4x8xbf16, #tpu.memory_space<vmem>>, %arg4: memref<8x1x1x4x8xbf16, #tpu.memory_space<vmem>>, %arg5: memref<8x1x4x8xbf16, #tpu.memory_space<vmem>>) attributes {dimension_semantics = [#tpu.dimension_semantics<parallel>, #tpu.dimension_semantics<parallel>], iteration_bounds = array<i64: 2, 1>, scalar_prefetch = 0 : i64, scratch_operands = 0 : i64, tpu.core_type = #tpu.core_type<tc>, window_params = [{transform_indices = @transform_0, window_bounds = array<i64: 8, 1, 1, 4, 8>}, {transform_indices = @transform_1, window_bounds = array<i64: 8, 1, 1, 4, 8>}, {transform_indices = @transform_2, window_bounds = array<i64: 8, 1, 1, 4, 8>}, {transform_indices = @transform_3, window_bounds = array<i64: 8, 1, 4, 8>}]} {
    %c0 = arith.constant 0 : index
    %c0_0 = arith.constant 0 : index
    %c0_1 = arith.constant 0 : index
    %c0_2 = arith.constant 0 : index
    %c0_3 = arith.constant 0 : index
    %0 = vector.load %arg2[%c0, %c0_0, %c0_1, %c0_2, %c0_3] : memref<8x1x1x4x8xbf16, #tpu.memory_space<vmem>>, vector<8x1x1x4x8xbf16>
    %1 = vector.shape_cast %0 : vector<8x1x1x4x8xbf16> to vector<8x4x8xbf16>
    %c0_4 = arith.constant 0 : index
    %c0_5 = arith.constant 0 : index
    %c0_6 = arith.constant 0 : index
    %c0_7 = arith.constant 0 : index
    %c0_8 = arith.constant 0 : index
    %2 = vector.load %arg3[%c0_4, %c0_5, %c0_6, %c0_7, %c0_8] : memref<8x1x1x4x8xbf16, #tpu.memory_space<vmem>>, vector<8x1x1x4x8xbf16>
    %3 = vector.shape_cast %2 : vector<8x1x1x4x8xbf16> to vector<8x4x8xbf16>
    %c0_9 = arith.constant 0 : index
    %c0_10 = arith.constant 0 : index
    %c0_11 = arith.constant 0 : index
    %c0_12 = arith.constant 0 : index
    %c0_13 = arith.constant 0 : index
    %4 = vector.load %arg4[%c0_9, %c0_10, %c0_11, %c0_12, %c0_13] : memref<8x1x1x4x8xbf16, #tpu.memory_space<vmem>>, vector<8x1x1x4x8xbf16>
    %5 = vector.shape_cast %4 : vector<8x1x1x4x8xbf16> to vector<8x4x8xbf16>
    %6 = tpu.iota {dimensions = array<i32: 0>} : vector<8x8xi32>
    %7 = tpu.iota {dimensions = array<i32: 1>} : vector<8x8xi32>
    %8 = arith.cmpi sle, %7, %6 : vector<8x8xi32>
    %9 = vector.extract_strided_slice %1 {offsets = [0, 0, 0], sizes = [8, 1, 8], strides = [1, 1, 1]} : vector<8x4x8xbf16> to vector<8x1x8xbf16>
    %10 = vector.shape_cast %9 : vector<8x1x8xbf16> to vector<8x8xbf16>
    %11 = vector.extract_strided_slice %3 {offsets = [0, 0, 0], sizes = [8, 1, 8], strides = [1, 1, 1]} : vector<8x4x8xbf16> to vector<8x1x8xbf16>
    %12 = vector.shape_cast %11 : vector<8x1x8xbf16> to vector<8x8xbf16>
    %13 = vector.extract_strided_slice %5 {offsets = [0, 0, 0], sizes = [8, 1, 8], strides = [1, 1, 1]} : vector<8x4x8xbf16> to vector<8x1x8xbf16>
    %14 = vector.shape_cast %13 : vector<8x1x8xbf16> to vector<8x8xbf16>
    %15 = tpu.transpose %12, [1, 0] : vector<8x8xbf16> -> vector<8x8xbf16>
    %cst = arith.constant dense<0.000000e+00> : vector<8x8xf32>
    %16 = tpu.matmul %10, %15, %cst {dimension_numbers = #tpu.dot_dimension_numbers<[1], [0], [0], [1], [0, 0, 1, 1], [], []>} : vector<8x8xbf16>, vector<8x8xbf16>, vector<8x8xf32> -> vector<8x8xf32>
    %cst_14 = arith.constant 0xFF800000 : f32
    %17 = vector.broadcast %cst_14 : f32 to vector<8x8xf32>
    %18 = arith.select %8, %16, %17 : vector<8x8xi1>, vector<8x8xf32>
    %cst_15 = arith.constant dense<0xFF800000> : vector<8xf32>
    %19 = vector.multi_reduction <maximumf>, %18, %cst_15 [1] : vector<8x8xf32> to vector<8xf32>
    %20 = vector.shape_cast %19 : vector<8xf32> to vector<8x1xf32>
    %21 = vector.broadcast %20 : vector<8x1xf32> to vector<8x8xf32>
    %22 = arith.subf %18, %21 : vector<8x8xf32>
    %23 = math.exp %22 : vector<8x8xf32>
    %cst_16 = arith.constant dense<0.000000e+00> : vector<8xf32>
    %24 = vector.multi_reduction <add>, %23, %cst_16 [1] : vector<8x8xf32> to vector<8xf32>
    %25 = vector.shape_cast %24 : vector<8xf32> to vector<8x1xf32>
    %26 = arith.truncf %23 : vector<8x8xf32> to vector<8x8xbf16>
    %cst_17 = arith.constant dense<0.000000e+00> : vector<8x8xf32>
    %27 = tpu.matmul %26, %14, %cst_17 {dimension_numbers = #tpu.dot_dimension_numbers<[1], [0], [0], [1], [0, 0, 1, 1], [], []>} : vector<8x8xbf16>, vector<8x8xbf16>, vector<8x8xf32> -> vector<8x8xf32>
    %28 = tpu.reciprocal %25 {approx = true} : vector<8x1xf32> -> vector<8x1xf32>
    %29 = vector.broadcast %28 : vector<8x1xf32> to vector<8x8xf32>
    %30 = arith.mulf %27, %29 : vector<8x8xf32>
    %31 = arith.truncf %30 : vector<8x8xf32> to vector<8x8xbf16>
    %c0_18 = arith.constant 0 : index
    %c0_19 = arith.constant 0 : index
    %c0_20 = arith.constant 0 : index
    %c0_21 = arith.constant 0 : index
    %32 = vector.load %arg5[%c0_18, %c0_19, %c0_20, %c0_21] : memref<8x1x4x8xbf16, #tpu.memory_space<vmem>>, vector<8x1x1x8xbf16>
    %33 = vector.shape_cast %32 : vector<8x1x1x8xbf16> to vector<8x8xbf16>
    %34 = vector.shape_cast %31 : vector<8x8xbf16> to vector<8x1x1x8xbf16>
    tpu.vector_store %arg5[%c0_18, %c0_19, %c0_20, %c0_21], %34 {strides = array<i32>} : memref<8x1x4x8xbf16, #tpu.memory_space<vmem>>, vector<8x1x1x8xbf16>,
    %35 = vector.extract_strided_slice %1 {offsets = [0, 1, 0], sizes = [8, 1, 8], strides = [1, 1, 1]} : vector<8x4x8xbf16> to vector<8x1x8xbf16>
    %36 = vector.shape_cast %35 : vector<8x1x8xbf16> to vector<8x8xbf16>
    %37 = vector.extract_strided_slice %3 {offsets = [0, 1, 0], sizes = [8, 1, 8], strides = [1, 1, 1]} : vector<8x4x8xbf16> to vector<8x1x8xbf16>
    %38 = vector.shape_cast %37 : vector<8x1x8xbf16> to vector<8x8xbf16>
    %39 = vector.extract_strided_slice %5 {offsets = [0, 1, 0], sizes = [8, 1, 8], strides = [1, 1, 1]} : vector<8x4x8xbf16> to vector<8x1x8xbf16>
    %40 = vector.shape_cast %39 : vector<8x1x8xbf16> to vector<8x8xbf16>
    %41 = tpu.transpose %38, [1, 0] : vector<8x8xbf16> -> vector<8x8xbf16>
    %cst_22 = arith.constant dense<0.000000e+00> : vector<8x8xf32>
    %42 = tpu.matmul %36, %41, %cst_22 {dimension_numbers = #tpu.dot_dimension_numbers<[1], [0], [0], [1], [0, 0, 1, 1], [], []>} : vector<8x8xbf16>, vector<8x8xbf16>, vector<8x8xf32> -> vector<8x8xf32>
    %cst_23 = arith.constant 0xFF800000 : f32
    %43 = vector.broadcast %cst_23 : f32 to vector<8x8xf32>
    %44 = arith.select %8, %42, %43 : vector<8x8xi1>, vector<8x8xf32>
    %cst_24 = arith.constant dense<0xFF800000> : vector<8xf32>
    %45 = vector.multi_reduction <maximumf>, %44, %cst_24 [1] : vector<8x8xf32> to vector<8xf32>
    %46 = vector.shape_cast %45 : vector<8xf32> to vector<8x1xf32>
    %47 = vector.broadcast %46 : vector<8x1xf32> to vector<8x8xf32>
    %48 = arith.subf %44, %47 : vector<8x8xf32>
    %49 = math.exp %48 : vector<8x8xf32>
    %cst_25 = arith.constant dense<0.000000e+00> : vector<8xf32>
    %50 = vector.multi_reduction <add>, %49, %cst_25 [1] : vector<8x8xf32> to vector<8xf32>
    %51 = vector.shape_cast %50 : vector<8xf32> to vector<8x1xf32>
    %52 = arith.truncf %49 : vector<8x8xf32> to vector<8x8xbf16>
    %cst_26 = arith.constant dense<0.000000e+00> : vector<8x8xf32>
    %53 = tpu.matmul %52, %40, %cst_26 {dimension_numbers = #tpu.dot_dimension_numbers<[1], [0], [0], [1], [0, 0, 1, 1], [], []>} : vector<8x8xbf16>, vector<8x8xbf16>, vector<8x8xf32> -> vector<8x8xf32>
    %54 = tpu.reciprocal %51 {approx = true} : vector<8x1xf32> -> vector<8x1xf32>
    %55 = vector.broadcast %54 : vector<8x1xf32> to vector<8x8xf32>
    %56 = arith.mulf %53, %55 : vector<8x8xf32>
    %57 = arith.truncf %56 : vector<8x8xf32> to vector<8x8xbf16>
    %c0_27 = arith.constant 0 : index
    %c0_28 = arith.constant 0 : index
    %c1 = arith.constant 1 : index
    %c0_29 = arith.constant 0 : index
    %58 = vector.load %arg5[%c0_27, %c0_28, %c1, %c0_29] : memref<8x1x4x8xbf16, #tpu.memory_space<vmem>>, vector<8x1x1x8xbf16>
    %59 = vector.shape_cast %58 : vector<8x1x1x8xbf16> to vector<8x8xbf16>
    %60 = vector.shape_cast %57 : vector<8x8xbf16> to vector<8x1x1x8xbf16>
    tpu.vector_store %arg5[%c0_27, %c0_28, %c1, %c0_29], %60 {strides = array<i32>} : memref<8x1x4x8xbf16, #tpu.memory_space<vmem>>, vector<8x1x1x8xbf16>,
    %61 = vector.extract_strided_slice %1 {offsets = [0, 2, 0], sizes = [8, 1, 8], strides = [1, 1, 1]} : vector<8x4x8xbf16> to vector<8x1x8xbf16>
    %62 = vector.shape_cast %61 : vector<8x1x8xbf16> to vector<8x8xbf16>
    %63 = vector.extract_strided_slice %3 {offsets = [0, 2, 0], sizes = [8, 1, 8], strides = [1, 1, 1]} : vector<8x4x8xbf16> to vector<8x1x8xbf16>
    %64 = vector.shape_cast %63 : vector<8x1x8xbf16> to vector<8x8xbf16>
    %65 = vector.extract_strided_slice %5 {offsets = [0, 2, 0], sizes = [8, 1, 8], strides = [1, 1, 1]} : vector<8x4x8xbf16> to vector<8x1x8xbf16>
    %66 = vector.shape_cast %65 : vector<8x1x8xbf16> to vector<8x8xbf16>
    %67 = tpu.transpose %64, [1, 0] : vector<8x8xbf16> -> vector<8x8xbf16>
    %cst_30 = arith.constant dense<0.000000e+00> : vector<8x8xf32>
    %68 = tpu.matmul %62, %67, %cst_30 {dimension_numbers = #tpu.dot_dimension_numbers<[1], [0], [0], [1], [0, 0, 1, 1], [], []>} : vector<8x8xbf16>, vector<8x8xbf16>, vector<8x8xf32> -> vector<8x8xf32>
    %cst_31 = arith.constant 0xFF800000 : f32
    %69 = vector.broadcast %cst_31 : f32 to vector<8x8xf32>
    %70 = arith.select %8, %68, %69 : vector<8x8xi1>, vector<8x8xf32>
    %cst_32 = arith.constant dense<0xFF800000> : vector<8xf32>
    %71 = vector.multi_reduction <maximumf>, %70, %cst_32 [1] : vector<8x8xf32> to vector<8xf32>
    %72 = vector.shape_cast %71 : vector<8xf32> to vector<8x1xf32>
    %73 = vector.broadcast %72 : vector<8x1xf32> to vector<8x8xf32>
    %74 = arith.subf %70, %73 : vector<8x8xf32>
    %75 = math.exp %74 : vector<8x8xf32>
    %cst_33 = arith.constant dense<0.000000e+00> : vector<8xf32>
    %76 = vector.multi_reduction <add>, %75, %cst_33 [1] : vector<8x8xf32> to vector<8xf32>
    %77 = vector.shape_cast %76 : vector<8xf32> to vector<8x1xf32>
    %78 = arith.truncf %75 : vector<8x8xf32> to vector<8x8xbf16>
    %cst_34 = arith.constant dense<0.000000e+00> : vector<8x8xf32>
    %79 = tpu.matmul %78, %66, %cst_34 {dimension_numbers = #tpu.dot_dimension_numbers<[1], [0], [0], [1], [0, 0, 1, 1], [], []>} : vector<8x8xbf16>, vector<8x8xbf16>, vector<8x8xf32> -> vector<8x8xf32>
    %80 = tpu.reciprocal %77 {approx = true} : vector<8x1xf32> -> vector<8x1xf32>
    %81 = vector.broadcast %80 : vector<8x1xf32> to vector<8x8xf32>
    %82 = arith.mulf %79, %81 : vector<8x8xf32>
    %83 = arith.truncf %82 : vector<8x8xf32> to vector<8x8xbf16>
    %c0_35 = arith.constant 0 : index
    %c0_36 = arith.constant 0 : index
    %c2 = arith.constant 2 : index
    %c0_37 = arith.constant 0 : index
    %84 = vector.load %arg5[%c0_35, %c0_36, %c2, %c0_37] : memref<8x1x4x8xbf16, #tpu.memory_space<vmem>>, vector<8x1x1x8xbf16>
    %85 = vector.shape_cast %84 : vector<8x1x1x8xbf16> to vector<8x8xbf16>
    %86 = vector.shape_cast %83 : vector<8x8xbf16> to vector<8x1x1x8xbf16>
    tpu.vector_store %arg5[%c0_35, %c0_36, %c2, %c0_37], %86 {strides = array<i32>} : memref<8x1x4x8xbf16, #tpu.memory_space<vmem>>, vector<8x1x1x8xbf16>,
    %87 = vector.extract_strided_slice %1 {offsets = [0, 3, 0], sizes = [8, 1, 8], strides = [1, 1, 1]} : vector<8x4x8xbf16> to vector<8x1x8xbf16>
    %88 = vector.shape_cast %87 : vector<8x1x8xbf16> to vector<8x8xbf16>
    %89 = vector.extract_strided_slice %3 {offsets = [0, 3, 0], sizes = [8, 1, 8], strides = [1, 1, 1]} : vector<8x4x8xbf16> to vector<8x1x8xbf16>
    %90 = vector.shape_cast %89 : vector<8x1x8xbf16> to vector<8x8xbf16>
    %91 = vector.extract_strided_slice %5 {offsets = [0, 3, 0], sizes = [8, 1, 8], strides = [1, 1, 1]} : vector<8x4x8xbf16> to vector<8x1x8xbf16>
    %92 = vector.shape_cast %91 : vector<8x1x8xbf16> to vector<8x8xbf16>
    %93 = tpu.transpose %90, [1, 0] : vector<8x8xbf16> -> vector<8x8xbf16>
    %cst_38 = arith.constant dense<0.000000e+00> : vector<8x8xf32>
    %94 = tpu.matmul %88, %93, %cst_38 {dimension_numbers = #tpu.dot_dimension_numbers<[1], [0], [0], [1], [0, 0, 1, 1], [], []>} : vector<8x8xbf16>, vector<8x8xbf16>, vector<8x8xf32> -> vector<8x8xf32>
    %cst_39 = arith.constant 0xFF800000 : f32
    %95 = vector.broadcast %cst_39 : f32 to vector<8x8xf32>
    %96 = arith.select %8, %94, %95 : vector<8x8xi1>, vector<8x8xf32>
    %cst_40 = arith.constant dense<0xFF800000> : vector<8xf32>
    %97 = vector.multi_reduction <maximumf>, %96, %cst_40 [1] : vector<8x8xf32> to vector<8xf32>
    %98 = vector.shape_cast %97 : vector<8xf32> to vector<8x1xf32>
    %99 = vector.broadcast %98 : vector<8x1xf32> to vector<8x8xf32>
    %100 = arith.subf %96, %99 : vector<8x8xf32>
    %101 = math.exp %100 : vector<8x8xf32>
    %cst_41 = arith.constant dense<0.000000e+00> : vector<8xf32>
    %102 = vector.multi_reduction <add>, %101, %cst_41 [1] : vector<8x8xf32> to vector<8xf32>
    %103 = vector.shape_cast %102 : vector<8xf32> to vector<8x1xf32>
    %104 = arith.truncf %101 : vector<8x8xf32> to vector<8x8xbf16>
    %cst_42 = arith.constant dense<0.000000e+00> : vector<8x8xf32>
    %105 = tpu.matmul %104, %92, %cst_42 {dimension_numbers = #tpu.dot_dimension_numbers<[1], [0], [0], [1], [0, 0, 1, 1], [], []>} : vector<8x8xbf16>, vector<8x8xbf16>, vector<8x8xf32> -> vector<8x8xf32>
    %106 = tpu.reciprocal %103 {approx = true} : vector<8x1xf32> -> vector<8x1xf32>
    %107 = vector.broadcast %106 : vector<8x1xf32> to vector<8x8xf32>
    %108 = arith.mulf %105, %107 : vector<8x8xf32>
    %109 = arith.truncf %108 : vector<8x8xf32> to vector<8x8xbf16>
    %c0_43 = arith.constant 0 : index
    %c0_44 = arith.constant 0 : index
    %c3 = arith.constant 3 : index
    %c0_45 = arith.constant 0 : index
    %110 = vector.load %arg5[%c0_43, %c0_44, %c3, %c0_45] : memref<8x1x4x8xbf16, #tpu.memory_space<vmem>>, vector<8x1x1x8xbf16>
    %111 = vector.shape_cast %110 : vector<8x1x1x8xbf16> to vector<8x8xbf16>
    %112 = vector.shape_cast %109 : vector<8x8xbf16> to vector<8x1x1x8xbf16>
    tpu.vector_store %arg5[%c0_43, %c0_44, %c3, %c0_45], %112 {strides = array<i32>} : memref<8x1x4x8xbf16, #tpu.memory_space<vmem>>, vector<8x1x1x8xbf16>,
    return
  }
  func.func @transform_0(%arg0: i32, %arg1: i32) -> (i32, i32, i32, i32, i32) {
    %c0_i32 = arith.constant 0 : i32
    %c0_i32_0 = arith.constant 0 : i32
    %c0_i32_1 = arith.constant 0 : i32
    %c0_i32_2 = arith.constant 0 : i32
    return %c0_i32, %arg0, %c0_i32_0, %arg1, %c0_i32_1 : i32, i32, i32, i32, i32
  }
  func.func @transform_1(%arg0: i32, %arg1: i32) -> (i32, i32, i32, i32, i32) {
    %c0_i32 = arith.constant 0 : i32
    %c1_i32 = arith.constant 1 : i32
    %c0_i32_0 = arith.constant 0 : i32
    %c0_i32_1 = arith.constant 0 : i32
    return %c0_i32, %arg0, %c1_i32, %arg1, %c0_i32_0 : i32, i32, i32, i32, i32
  }
  func.func @transform_2(%arg0: i32, %arg1: i32) -> (i32, i32, i32, i32, i32) {
    %c0_i32 = arith.constant 0 : i32
    %c2_i32 = arith.constant 2 : i32
    %c0_i32_0 = arith.constant 0 : i32
    %c0_i32_1 = arith.constant 0 : i32
    return %c0_i32, %arg0, %c2_i32, %arg1, %c0_i32_0 : i32, i32, i32, i32, i32
  }
  func.func @transform_3(%arg0: i32, %arg1: i32) -> (i32, i32, i32, i32) {
    %c0_i32 = arith.constant 0 : i32
    %c0_i32_0 = arith.constant 0 : i32
    %c0_i32_1 = arith.constant 0 : i32
    return %c0_i32, %arg0, %arg1, %c0_i32_0 : i32, i32, i32, i32
  }
}

module attributes {stable_mosaic.version = 11 : i64} {
  func.func @_linear_add_ln_kernel(%arg0: i32, %arg1: memref<16x32xbf16, #tpu.memory_space<vmem>>, %arg2: memref<32x32xbf16, #tpu.memory_space<vmem>>, %arg3: memref<1x32xf32, #tpu.memory_space<vmem>>, %arg4: memref<16x32xf32, #tpu.memory_space<vmem>>, %arg5: memref<1x32xf32, #tpu.memory_space<vmem>>, %arg6: memref<1x32xf32, #tpu.memory_space<vmem>>, %arg7: memref<16x32xf32, #tpu.memory_space<vmem>>) attributes {dimension_semantics = [#tpu.dimension_semantics<parallel>], iteration_bounds = array<i64: 1>, scalar_prefetch = 0 : i64, scratch_operands = 0 : i64, tpu.core_type = #tpu.core_type<tc>, window_params = [{transform_indices = @transform_0, window_bounds = array<i64: 16, 32>}, {pipeline_mode = #tpu.pipeline_mode<synchronous>, transform_indices = @transform_1, window_bounds = array<i64: 32, 32>}, {pipeline_mode = #tpu.pipeline_mode<synchronous>, transform_indices = @transform_2, window_bounds = array<i64: 1, 32>}, {transform_indices = @transform_3, window_bounds = array<i64: 16, 32>}, {pipeline_mode = #tpu.pipeline_mode<synchronous>, transform_indices = @transform_4, window_bounds = array<i64: 1, 32>}, {pipeline_mode = #tpu.pipeline_mode<synchronous>, transform_indices = @transform_5, window_bounds = array<i64: 1, 32>}, {transform_indices = @transform_6, window_bounds = array<i64: 16, 32>}]} {
    %c0 = arith.constant 0 : index
    %c0_0 = arith.constant 0 : index
    %0 = vector.load %arg1[%c0, %c0_0] : memref<16x32xbf16, #tpu.memory_space<vmem>>, vector<16x32xbf16>
    %c0_1 = arith.constant 0 : index
    %c0_2 = arith.constant 0 : index
    %1 = vector.load %arg2[%c0_1, %c0_2] : memref<32x32xbf16, #tpu.memory_space<vmem>>, vector<32x32xbf16>
    %cst = arith.constant dense<0.000000e+00> : vector<16x32xf32>
    %2 = tpu.matmul %0, %1, %cst {dimension_numbers = #tpu.dot_dimension_numbers<[1], [0], [0], [1], [0, 0, 1, 1], [], []>} : vector<16x32xbf16>, vector<32x32xbf16>, vector<16x32xf32> -> vector<16x32xf32>
    %c0_3 = arith.constant 0 : index
    %c0_4 = arith.constant 0 : index
    %3 = vector.load %arg3[%c0_3, %c0_4] : memref<1x32xf32, #tpu.memory_space<vmem>>, vector<1x32xf32>
    %4 = vector.broadcast %3 : vector<1x32xf32> to vector<16x32xf32>
    %5 = arith.addf %2, %4 : vector<16x32xf32>
    %c0_5 = arith.constant 0 : index
    %c0_6 = arith.constant 0 : index
    %6 = vector.load %arg4[%c0_5, %c0_6] : memref<16x32xf32, #tpu.memory_space<vmem>>, vector<16x32xf32>
    %7 = arith.addf %5, %6 : vector<16x32xf32>
    %cst_7 = arith.constant dense<0.000000e+00> : vector<16xf32>
    %8 = vector.multi_reduction <add>, %7, %cst_7 [1] : vector<16x32xf32> to vector<16xf32>
    %9 = vector.shape_cast %8 : vector<16xf32> to vector<16x1xf32>
    %cst_8 = arith.constant 3.200000e+01 : f32
    %10 = vector.broadcast %cst_8 : f32 to vector<16x1xf32>
    %11 = arith.divf %9, %10 : vector<16x1xf32>
    %12 = vector.broadcast %11 : vector<16x1xf32> to vector<16x32xf32>
    %13 = arith.subf %7, %12 : vector<16x32xf32>
    %14 = arith.mulf %13, %13 : vector<16x32xf32>
    %cst_9 = arith.constant dense<0.000000e+00> : vector<16xf32>
    %15 = vector.multi_reduction <add>, %14, %cst_9 [1] : vector<16x32xf32> to vector<16xf32>
    %16 = vector.shape_cast %15 : vector<16xf32> to vector<16x1xf32>
    %cst_10 = arith.constant 3.200000e+01 : f32
    %17 = vector.broadcast %cst_10 : f32 to vector<16x1xf32>
    %18 = arith.divf %16, %17 : vector<16x1xf32>
    %19 = vector.broadcast %11 : vector<16x1xf32> to vector<16x32xf32>
    %20 = arith.subf %7, %19 : vector<16x32xf32>
    %cst_11 = arith.constant 9.99999974E-6 : f32
    %21 = vector.broadcast %cst_11 : f32 to vector<16x1xf32>
    %22 = arith.addf %18, %21 : vector<16x1xf32>
    %23 = math.rsqrt %22 : vector<16x1xf32>
    %24 = vector.broadcast %23 : vector<16x1xf32> to vector<16x32xf32>
    %25 = arith.mulf %20, %24 : vector<16x32xf32>
    %c0_12 = arith.constant 0 : index
    %c0_13 = arith.constant 0 : index
    %26 = vector.load %arg5[%c0_12, %c0_13] : memref<1x32xf32, #tpu.memory_space<vmem>>, vector<1x32xf32>
    %27 = vector.broadcast %26 : vector<1x32xf32> to vector<16x32xf32>
    %28 = arith.mulf %25, %27 : vector<16x32xf32>
    %c0_14 = arith.constant 0 : index
    %c0_15 = arith.constant 0 : index
    %29 = vector.load %arg6[%c0_14, %c0_15] : memref<1x32xf32, #tpu.memory_space<vmem>>, vector<1x32xf32>
    %30 = vector.broadcast %29 : vector<1x32xf32> to vector<16x32xf32>
    %31 = arith.addf %28, %30 : vector<16x32xf32>
    %c0_16 = arith.constant 0 : index
    %c0_17 = arith.constant 0 : index
    %32 = vector.load %arg7[%c0_16, %c0_17] : memref<16x32xf32, #tpu.memory_space<vmem>>, vector<16x32xf32>
    tpu.vector_store %arg7[%c0_16, %c0_17], %31 {strides = array<i32>} : memref<16x32xf32, #tpu.memory_space<vmem>>, vector<16x32xf32>,
    return
  }
  func.func @transform_0(%arg0: i32) -> (i32, i32) {
    %c0_i32 = arith.constant 0 : i32
    %c0_i32_0 = arith.constant 0 : i32
    return %arg0, %c0_i32 : i32, i32
  }
  func.func @transform_1(%arg0: i32) -> (i32, i32) {
    %c0_i32 = arith.constant 0 : i32
    %c0_i32_0 = arith.constant 0 : i32
    %c0_i32_1 = arith.constant 0 : i32
    return %c0_i32, %c0_i32_0 : i32, i32
  }
  func.func @transform_2(%arg0: i32) -> (i32, i32) {
    %c0_i32 = arith.constant 0 : i32
    %c0_i32_0 = arith.constant 0 : i32
    %c0_i32_1 = arith.constant 0 : i32
    return %c0_i32, %c0_i32_0 : i32, i32
  }
  func.func @transform_3(%arg0: i32) -> (i32, i32) {
    %c0_i32 = arith.constant 0 : i32
    %c0_i32_0 = arith.constant 0 : i32
    return %arg0, %c0_i32 : i32, i32
  }
  func.func @transform_4(%arg0: i32) -> (i32, i32) {
    %c0_i32 = arith.constant 0 : i32
    %c0_i32_0 = arith.constant 0 : i32
    %c0_i32_1 = arith.constant 0 : i32
    return %c0_i32, %c0_i32_0 : i32, i32
  }
  func.func @transform_5(%arg0: i32) -> (i32, i32) {
    %c0_i32 = arith.constant 0 : i32
    %c0_i32_0 = arith.constant 0 : i32
    %c0_i32_1 = arith.constant 0 : i32
    return %c0_i32, %c0_i32_0 : i32, i32
  }
  func.func @transform_6(%arg0: i32) -> (i32, i32) {
    %c0_i32 = arith.constant 0 : i32
    %c0_i32_0 = arith.constant 0 : i32
    return %arg0, %c0_i32 : i32, i32
  }
}

module attributes {stable_mosaic.version = 11 : i64} {
  func.func @_linear_nok_kernel(%arg0: i32, %arg1: memref<16x32xf32, #tpu.memory_space<vmem>>, %arg2: memref<32x64xbf16, #tpu.memory_space<vmem>>, %arg3: memref<1x64xf32, #tpu.memory_space<vmem>>, %arg4: memref<16x64xbf16, #tpu.memory_space<vmem>>) attributes {dimension_semantics = [#tpu.dimension_semantics<parallel>], iteration_bounds = array<i64: 1>, scalar_prefetch = 0 : i64, scratch_operands = 0 : i64, tpu.core_type = #tpu.core_type<tc>, window_params = [{transform_indices = @transform_0, window_bounds = array<i64: 16, 32>}, {pipeline_mode = #tpu.pipeline_mode<synchronous>, transform_indices = @transform_1, window_bounds = array<i64: 32, 64>}, {pipeline_mode = #tpu.pipeline_mode<synchronous>, transform_indices = @transform_2, window_bounds = array<i64: 1, 64>}, {transform_indices = @transform_3, window_bounds = array<i64: 16, 64>}]} {
    %c0 = arith.constant 0 : index
    %c0_0 = arith.constant 0 : index
    %0 = vector.load %arg1[%c0, %c0_0] : memref<16x32xf32, #tpu.memory_space<vmem>>, vector<16x32xf32>
    %1 = arith.truncf %0 : vector<16x32xf32> to vector<16x32xbf16>
    %c0_1 = arith.constant 0 : index
    %c0_2 = arith.constant 0 : index
    %2 = vector.load %arg2[%c0_1, %c0_2] : memref<32x64xbf16, #tpu.memory_space<vmem>>, vector<32x64xbf16>
    %cst = arith.constant dense<0.000000e+00> : vector<16x64xf32>
    %3 = tpu.matmul %1, %2, %cst {dimension_numbers = #tpu.dot_dimension_numbers<[1], [0], [0], [1], [0, 0, 1, 1], [], []>} : vector<16x32xbf16>, vector<32x64xbf16>, vector<16x64xf32> -> vector<16x64xf32>
    %c0_3 = arith.constant 0 : index
    %c0_4 = arith.constant 0 : index
    %4 = vector.load %arg3[%c0_3, %c0_4] : memref<1x64xf32, #tpu.memory_space<vmem>>, vector<1x64xf32>
    %5 = vector.broadcast %4 : vector<1x64xf32> to vector<16x64xf32>
    %6 = arith.addf %3, %5 : vector<16x64xf32>
    %cst_5 = arith.constant 0.000000e+00 : f32
    %7 = vector.broadcast %cst_5 : f32 to vector<16x64xf32>
    %8 = arith.maximumf %6, %7 : vector<16x64xf32>
    %9 = arith.truncf %8 : vector<16x64xf32> to vector<16x64xbf16>
    %c0_6 = arith.constant 0 : index
    %c0_7 = arith.constant 0 : index
    %10 = vector.load %arg4[%c0_6, %c0_7] : memref<16x64xbf16, #tpu.memory_space<vmem>>, vector<16x64xbf16>
    tpu.vector_store %arg4[%c0_6, %c0_7], %9 {strides = array<i32>} : memref<16x64xbf16, #tpu.memory_space<vmem>>, vector<16x64xbf16>,
    return
  }
  func.func @transform_0(%arg0: i32) -> (i32, i32) {
    %c0_i32 = arith.constant 0 : i32
    %c0_i32_0 = arith.constant 0 : i32
    return %arg0, %c0_i32 : i32, i32
  }
  func.func @transform_1(%arg0: i32) -> (i32, i32) {
    %c0_i32 = arith.constant 0 : i32
    %c0_i32_0 = arith.constant 0 : i32
    %c0_i32_1 = arith.constant 0 : i32
    return %c0_i32, %c0_i32_0 : i32, i32
  }
  func.func @transform_2(%arg0: i32) -> (i32, i32) {
    %c0_i32 = arith.constant 0 : i32
    %c0_i32_0 = arith.constant 0 : i32
    %c0_i32_1 = arith.constant 0 : i32
    return %c0_i32, %c0_i32_0 : i32, i32
  }
  func.func @transform_3(%arg0: i32) -> (i32, i32) {
    %c0_i32 = arith.constant 0 : i32
    %c0_i32_0 = arith.constant 0 : i32
    return %arg0, %c0_i32 : i32, i32
  }
}

module attributes {stable_mosaic.version = 11 : i64} {
  func.func @_linear_add_ln_kernel(%arg0: i32, %arg1: memref<16x64xbf16, #tpu.memory_space<vmem>>, %arg2: memref<64x32xbf16, #tpu.memory_space<vmem>>, %arg3: memref<1x32xf32, #tpu.memory_space<vmem>>, %arg4: memref<16x32xf32, #tpu.memory_space<vmem>>, %arg5: memref<1x32xf32, #tpu.memory_space<vmem>>, %arg6: memref<1x32xf32, #tpu.memory_space<vmem>>, %arg7: memref<16x32xf32, #tpu.memory_space<vmem>>) attributes {dimension_semantics = [#tpu.dimension_semantics<parallel>], iteration_bounds = array<i64: 1>, scalar_prefetch = 0 : i64, scratch_operands = 0 : i64, tpu.core_type = #tpu.core_type<tc>, window_params = [{transform_indices = @transform_0, window_bounds = array<i64: 16, 64>}, {pipeline_mode = #tpu.pipeline_mode<synchronous>, transform_indices = @transform_1, window_bounds = array<i64: 64, 32>}, {pipeline_mode = #tpu.pipeline_mode<synchronous>, transform_indices = @transform_2, window_bounds = array<i64: 1, 32>}, {transform_indices = @transform_3, window_bounds = array<i64: 16, 32>}, {pipeline_mode = #tpu.pipeline_mode<synchronous>, transform_indices = @transform_4, window_bounds = array<i64: 1, 32>}, {pipeline_mode = #tpu.pipeline_mode<synchronous>, transform_indices = @transform_5, window_bounds = array<i64: 1, 32>}, {transform_indices = @transform_6, window_bounds = array<i64: 16, 32>}]} {
    %c0 = arith.constant 0 : index
    %c0_0 = arith.constant 0 : index
    %0 = vector.load %arg1[%c0, %c0_0] : memref<16x64xbf16, #tpu.memory_space<vmem>>, vector<16x64xbf16>
    %c0_1 = arith.constant 0 : index
    %c0_2 = arith.constant 0 : index
    %1 = vector.load %arg2[%c0_1, %c0_2] : memref<64x32xbf16, #tpu.memory_space<vmem>>, vector<64x32xbf16>
    %cst = arith.constant dense<0.000000e+00> : vector<16x32xf32>
    %2 = tpu.matmul %0, %1, %cst {dimension_numbers = #tpu.dot_dimension_numbers<[1], [0], [0], [1], [0, 0, 1, 1], [], []>} : vector<16x64xbf16>, vector<64x32xbf16>, vector<16x32xf32> -> vector<16x32xf32>
    %c0_3 = arith.constant 0 : index
    %c0_4 = arith.constant 0 : index
    %3 = vector.load %arg3[%c0_3, %c0_4] : memref<1x32xf32, #tpu.memory_space<vmem>>, vector<1x32xf32>
    %4 = vector.broadcast %3 : vector<1x32xf32> to vector<16x32xf32>
    %5 = arith.addf %2, %4 : vector<16x32xf32>
    %c0_5 = arith.constant 0 : index
    %c0_6 = arith.constant 0 : index
    %6 = vector.load %arg4[%c0_5, %c0_6] : memref<16x32xf32, #tpu.memory_space<vmem>>, vector<16x32xf32>
    %7 = arith.addf %5, %6 : vector<16x32xf32>
    %cst_7 = arith.constant dense<0.000000e+00> : vector<16xf32>
    %8 = vector.multi_reduction <add>, %7, %cst_7 [1] : vector<16x32xf32> to vector<16xf32>
    %9 = vector.shape_cast %8 : vector<16xf32> to vector<16x1xf32>
    %cst_8 = arith.constant 3.200000e+01 : f32
    %10 = vector.broadcast %cst_8 : f32 to vector<16x1xf32>
    %11 = arith.divf %9, %10 : vector<16x1xf32>
    %12 = vector.broadcast %11 : vector<16x1xf32> to vector<16x32xf32>
    %13 = arith.subf %7, %12 : vector<16x32xf32>
    %14 = arith.mulf %13, %13 : vector<16x32xf32>
    %cst_9 = arith.constant dense<0.000000e+00> : vector<16xf32>
    %15 = vector.multi_reduction <add>, %14, %cst_9 [1] : vector<16x32xf32> to vector<16xf32>
    %16 = vector.shape_cast %15 : vector<16xf32> to vector<16x1xf32>
    %cst_10 = arith.constant 3.200000e+01 : f32
    %17 = vector.broadcast %cst_10 : f32 to vector<16x1xf32>
    %18 = arith.divf %16, %17 : vector<16x1xf32>
    %19 = vector.broadcast %11 : vector<16x1xf32> to vector<16x32xf32>
    %20 = arith.subf %7, %19 : vector<16x32xf32>
    %cst_11 = arith.constant 9.99999974E-6 : f32
    %21 = vector.broadcast %cst_11 : f32 to vector<16x1xf32>
    %22 = arith.addf %18, %21 : vector<16x1xf32>
    %23 = math.rsqrt %22 : vector<16x1xf32>
    %24 = vector.broadcast %23 : vector<16x1xf32> to vector<16x32xf32>
    %25 = arith.mulf %20, %24 : vector<16x32xf32>
    %c0_12 = arith.constant 0 : index
    %c0_13 = arith.constant 0 : index
    %26 = vector.load %arg5[%c0_12, %c0_13] : memref<1x32xf32, #tpu.memory_space<vmem>>, vector<1x32xf32>
    %27 = vector.broadcast %26 : vector<1x32xf32> to vector<16x32xf32>
    %28 = arith.mulf %25, %27 : vector<16x32xf32>
    %c0_14 = arith.constant 0 : index
    %c0_15 = arith.constant 0 : index
    %29 = vector.load %arg6[%c0_14, %c0_15] : memref<1x32xf32, #tpu.memory_space<vmem>>, vector<1x32xf32>
    %30 = vector.broadcast %29 : vector<1x32xf32> to vector<16x32xf32>
    %31 = arith.addf %28, %30 : vector<16x32xf32>
    %c0_16 = arith.constant 0 : index
    %c0_17 = arith.constant 0 : index
    %32 = vector.load %arg7[%c0_16, %c0_17] : memref<16x32xf32, #tpu.memory_space<vmem>>, vector<16x32xf32>
    tpu.vector_store %arg7[%c0_16, %c0_17], %31 {strides = array<i32>} : memref<16x32xf32, #tpu.memory_space<vmem>>, vector<16x32xf32>,
    return
  }
  func.func @transform_0(%arg0: i32) -> (i32, i32) {
    %c0_i32 = arith.constant 0 : i32
    %c0_i32_0 = arith.constant 0 : i32
    return %arg0, %c0_i32 : i32, i32
  }
  func.func @transform_1(%arg0: i32) -> (i32, i32) {
    %c0_i32 = arith.constant 0 : i32
    %c0_i32_0 = arith.constant 0 : i32
    %c0_i32_1 = arith.constant 0 : i32
    return %c0_i32, %c0_i32_0 : i32, i32
  }
  func.func @transform_2(%arg0: i32) -> (i32, i32) {
    %c0_i32 = arith.constant 0 : i32
    %c0_i32_0 = arith.constant 0 : i32
    %c0_i32_1 = arith.constant 0 : i32
    return %c0_i32, %c0_i32_0 : i32, i32
  }
  func.func @transform_3(%arg0: i32) -> (i32, i32) {
    %c0_i32 = arith.constant 0 : i32
    %c0_i32_0 = arith.constant 0 : i32
    return %arg0, %c0_i32 : i32, i32
  }
  func.func @transform_4(%arg0: i32) -> (i32, i32) {
    %c0_i32 = arith.constant 0 : i32
    %c0_i32_0 = arith.constant 0 : i32
    %c0_i32_1 = arith.constant 0 : i32
    return %c0_i32, %c0_i32_0 : i32, i32
  }
  func.func @transform_5(%arg0: i32) -> (i32, i32) {
    %c0_i32 = arith.constant 0 : i32
    %c0_i32_0 = arith.constant 0 : i32
    %c0_i32_1 = arith.constant 0 : i32
    return %c0_i32, %c0_i32_0 : i32, i32
  }
  func.func @transform_6(%arg0: i32) -> (i32, i32) {
    %c0_i32 = arith.constant 0 : i32
    %c0_i32_0 = arith.constant 0 : i32
    return %arg0, %c0_i32 : i32, i32
  }
}

module attributes {stable_mosaic.version = 11 : i64} {
  func.func @_linear_nok_kernel(%arg0: i32, %arg1: memref<16x32xf32, #tpu.memory_space<vmem>>, %arg2: memref<32x32xbf16, #tpu.memory_space<vmem>>, %arg3: memref<1x32xf32, #tpu.memory_space<vmem>>, %arg4: memref<16x32xf32, #tpu.memory_space<vmem>>) attributes {dimension_semantics = [#tpu.dimension_semantics<parallel>], iteration_bounds = array<i64: 1>, scalar_prefetch = 0 : i64, scratch_operands = 0 : i64, tpu.core_type = #tpu.core_type<tc>, window_params = [{transform_indices = @transform_0, window_bounds = array<i64: 16, 32>}, {pipeline_mode = #tpu.pipeline_mode<synchronous>, transform_indices = @transform_1, window_bounds = array<i64: 32, 32>}, {pipeline_mode = #tpu.pipeline_mode<synchronous>, transform_indices = @transform_2, window_bounds = array<i64: 1, 32>}, {transform_indices = @transform_3, window_bounds = array<i64: 16, 32>}]} {
    %c0 = arith.constant 0 : index
    %c0_0 = arith.constant 0 : index
    %0 = vector.load %arg1[%c0, %c0_0] : memref<16x32xf32, #tpu.memory_space<vmem>>, vector<16x32xf32>
    %1 = arith.truncf %0 : vector<16x32xf32> to vector<16x32xbf16>
    %c0_1 = arith.constant 0 : index
    %c0_2 = arith.constant 0 : index
    %2 = vector.load %arg2[%c0_1, %c0_2] : memref<32x32xbf16, #tpu.memory_space<vmem>>, vector<32x32xbf16>
    %cst = arith.constant dense<0.000000e+00> : vector<16x32xf32>
    %3 = tpu.matmul %1, %2, %cst {dimension_numbers = #tpu.dot_dimension_numbers<[1], [0], [0], [1], [0, 0, 1, 1], [], []>} : vector<16x32xbf16>, vector<32x32xbf16>, vector<16x32xf32> -> vector<16x32xf32>
    %c0_3 = arith.constant 0 : index
    %c0_4 = arith.constant 0 : index
    %4 = vector.load %arg3[%c0_3, %c0_4] : memref<1x32xf32, #tpu.memory_space<vmem>>, vector<1x32xf32>
    %5 = vector.broadcast %4 : vector<1x32xf32> to vector<16x32xf32>
    %6 = arith.addf %3, %5 : vector<16x32xf32>
    %c0_5 = arith.constant 0 : index
    %c0_6 = arith.constant 0 : index
    %7 = vector.load %arg4[%c0_5, %c0_6] : memref<16x32xf32, #tpu.memory_space<vmem>>, vector<16x32xf32>
    tpu.vector_store %arg4[%c0_5, %c0_6], %6 {strides = array<i32>} : memref<16x32xf32, #tpu.memory_space<vmem>>, vector<16x32xf32>,
    return
  }
  func.func @transform_0(%arg0: i32) -> (i32, i32) {
    %c0_i32 = arith.constant 0 : i32
    %c0_i32_0 = arith.constant 0 : i32
    return %arg0, %c0_i32 : i32, i32
  }
  func.func @transform_1(%arg0: i32) -> (i32, i32) {
    %c0_i32 = arith.constant 0 : i32
    %c0_i32_0 = arith.constant 0 : i32
    %c0_i32_1 = arith.constant 0 : i32
    return %c0_i32, %c0_i32_0 : i32, i32
  }
  func.func @transform_2(%arg0: i32) -> (i32, i32) {
    %c0_i32 = arith.constant 0 : i32
    %c0_i32_0 = arith.constant 0 : i32
    %c0_i32_1 = arith.constant 0 : i32
    return %c0_i32, %c0_i32_0 : i32, i32
  }
  func.func @transform_3(%arg0: i32) -> (i32, i32) {
    %c0_i32 = arith.constant 0 : i32
    %c0_i32_0 = arith.constant 0 : i32
    return %arg0, %c0_i32 : i32, i32
  }
}

</mosaic_0001>

<bundles_post_ra>
// kernel: transformer_forward.13
= control target key start
LH: loop header
LB: loop body
LE: loop exit
PB: predicated region body
PF: predicated region fallthrough
CT: control target
= control target key end

     0   :  { %v124_v0 = vmov 0.0   ;;  %vm125_vm0 = vmmov 0   ;;  %vm41_vm1 = vcmask 261120   ;;  %vm94_vm2 = vcmask 781312   ;;  %s167_s1 = inlined_call_operand.vmem [shape: bf16[32,96], index: 1, kind: input, shape index: {}]   ;;  %s168_s0 = inlined_call_operand.vmem [shape: f32[16,32], index: 0, kind: input, shape index: {}]   ;;  %s169_s2 = inlined_call_operand.vmem [shape: f32[1,96], index: 2, kind: input, shape index: {}]   ;;  %s170_s3 = inlined_call_operand.vmem [shape: bf16[16,96], index: 3, kind: output, shape index: {}]  }
   0x1   :  { %112 = vmatprep.subr.bf16.mxu0 %v124_v0  ;;  %v122_v1 = vld [vmem:[%s167_s1] sm:$0xff]   ;;  %116 = vmatprep.mubr.msk.bf16.mxu0 %vm125_vm0, %v124_v0  ;;  %v123_v2 = vld [vmem:[%s167_s1 + $0x8] sm:$0xff]  }
   0x2   :  { %113 = vmatpush3.bf16.msra.mxu0 %v122_v1  ;;  %v15_v3 = vld [vmem:[%s168_s0] sm:$0xff]  ;;  %v16_v4 = vld [vmem:[%s168_s0 + $0x8] sm:$0xff] }
   0x3   :  { %114 = vmatprep.subr.bf16.mxu0 %v124_v0  ;;  %v17_v5 = vpack.c.bf16 %v16_v4, %v15_v3  ;;  %v101_v6 = vld [vmem:[%s169_s2] ss:$0 sm:$0xff] }
   0x6   :  { %115 = vmatpush3.bf16.msra.mxu0 %v123_v2 }
   0x9   :  { %117 = vmatmul.mubr.msk.bf16.vlgmr.msra.gmra.mrb[0].mxu0 %vm41_vm1, %v17_v5 }
  0xdc   :  { %v79_v7 = vpop.f32.mrb[0].mxu0 }
  0xdd   :  { %v80_v8 = vadd.f32 %v101_v6, %v79_v7  ;;  %v118_v9 = vpop.f32.mrb[1].mxu0 }
  0xde   :  { %v82_v10 = vpop.f32.mrb[2].mxu0 }
  0xdf   :  { %v107_v11 = vpack.c.bf16 %v80_v8, %v80_v8  ;;  %v83_v12 = vadd.f32 %v101_v6, %v82_v10  ;;  %v119_v13 = vpop.f32.mrb[3].mxu0 }
  0xe1   :  { %95 = vst.msk [vmem:[%s170_s3] sm:$0xf] %vm94_vm2, %v107_v11  ;;  %v108_v14 = vpack.c.bf16 %v83_v12, %v83_v12 }
  0xe3   :  { %96 = vst.msk [vmem:[%s170_s3 + $0x4] sm:$0xf] %vm94_vm2, %v108_v14 }

// kernel: transformer_forward.12
= control target key start
LH: loop header
LB: loop body
LE: loop exit
PB: predicated region body
PF: predicated region fallthrough
CT: control target
= control target key end

     0   :  { %vm91_vm0 = vcmask 254976   ;;  %s207_s0 = inlined_call_operand.vmem [shape: f32[8,2,32], index: 0, kind: input, shape index: {}]   ;;  %s208_s1 = inlined_call_operand.vmem [shape: f32[8,1,32], index: 1, kind: input, shape index: {}]   ;;  %s209_s2 = inlined_call_operand.vmem [shape: f32[8,2,32], index: 2, kind: output, shape index: {}]  }
   0x1   :  { %v11_v0 = vld [vmem:[%s207_s0] sm:$0x3]  ;;  %v12_v2 = vld [vmem:[%s207_s0 + $0x2] sm:$0x3]  ;;  %v13_v6 = vld [vmem:[%s207_s0 + $0x4] sm:$0x3] }
   0x2   :  { %v104_v1 = vld [vmem:[%s208_s1] ss:$0 sm:$0xff]  ;;  %v19_v3 = vmul.f32 5.656854, %v11_v0  ;;  %v20_v4 = vmul.f32 5.656854, %v12_v2 }
   0x3   :  { %v105_v5 = vld [vmem:[%s208_s1 + $0x1] ss:$0 sm:$0xff]  ;;  %v106_v7 = vld [vmem:[%s208_s1 + $0x2] ss:$0 sm:$0xff]  ;;  %v14_v8 = vld [vmem:[%s207_s0 + $0x6] sm:$0x3] }
   0x4   :  { %v83_v9 = vadd.f32 %v104_v1, %v19_v3  ;;  %v84_v10 = vadd.f32 %v105_v5, %v20_v4  ;;  %v21_v11 = vmul.f32 5.656854, %v13_v6  ;;  %v22_v12 = vmul.f32 5.656854, %v14_v8  ;;  %v107_v13 = vld [vmem:[%s208_s1 + $0x3] ss:$0 sm:$0xff] }
   0x5   :  { %v15_v14 = vld [vmem:[%s207_s0 + $0x8] sm:$0x3]  ;;  %v108_v15 = vld [vmem:[%s208_s1 + $0x4] ss:$0 sm:$0xff]  ;;  %v16_v16 = vld [vmem:[%s207_s0 + $0xa] sm:$0x3] }
   0x6   :  { %92 = vst.msk [vmem:[%s209_s2] sm:$0x3] %vm91_vm0, %v83_v9  ;;  %93 = vst.msk [vmem:[%s209_s2 + $0x2] sm:$0x3] %vm91_vm0, %v84_v10  ;;  %v85_v17 = vadd.f32 %v106_v7, %v21_v11  ;;  %v86_v18 = vadd.f32 %v107_v13, %v22_v12  ;;  %v23_v19 = vmul.f32 5.656854, %v15_v14 }
   0x7   :  { %v24_v20 = vmul.f32 5.656854, %v16_v16  ;;  %v109_v21 = vld [vmem:[%s208_s1 + $0x5] ss:$0 sm:$0xff]  ;;  %v17_v22 = vld [vmem:[%s207_s0 + $0xc] sm:$0x3] }
   0x8   :  { %v110_v23 = vld [vmem:[%s208_s1 + $0x6] ss:$0 sm:$0xff]  ;;  %v18_v24 = vld [vmem:[%s207_s0 + $0xe] sm:$0x3]  ;;  %94 = vst.msk [vmem:[%s209_s2 + $0x4] sm:$0x3] %vm91_vm0, %v85_v17  ;;  %v87_v25 = vadd.f32 %v108_v15, %v23_v19 }
   0x9   :  { %95 = vst.msk [vmem:[%s209_s2 + $0x6] sm:$0x3] %vm91_vm0, %v86_v18  ;;  %v88_v26 = vadd.f32 %v109_v21, %v24_v20  ;;  %v25_v27 = vmul.f32 5.656854, %v17_v22  ;;  %v26_v28 = vmul.f32 5.656854, %v18_v24 }
   0xa   :  { %v111_v29 = vld [vmem:[%s208_s1 + $0x7] ss:$0 sm:$0xff]  ;;  %96 = vst.msk [vmem:[%s209_s2 + $0x8] sm:$0x3] %vm91_vm0, %v87_v25 }
   0xb   :  { %97 = vst.msk [vmem:[%s209_s2 + $0xa] sm:$0x3] %vm91_vm0, %v88_v26  ;;  %v89_v30 = vadd.f32 %v110_v23, %v25_v27  ;;  %v90_v31 = vadd.f32 %v111_v29, %v26_v28 }
   0xd   :  { %98 = vst.msk [vmem:[%s209_s2 + $0xc] sm:$0x3] %vm91_vm0, %v89_v30  ;;  %99 = vst.msk [vmem:[%s209_s2 + $0xe] sm:$0x3] %vm91_vm0, %v90_v31 }

// kernel: transformer_forward.15
= control target key start
LH: loop header
LB: loop body
LE: loop exit
PB: predicated region body
PF: predicated region fallthrough
CT: control target
= control target key end

     0   :  { %v181_v0 = vmov 0.0   ;;  %vm182_vm0 = vmmov 0   ;;  %vm54_vm1 = vcmask 261120   ;;  %s255_s1 = inlined_call_operand.vmem [shape: bf16[32,32], index: 1, kind: input, shape index: {}]   ;;  %s256_s0 = inlined_call_operand.vmem [shape: bf16[16,32], index: 0, kind: input, shape index: {}]   ;;  %s257_s2 = inlined_call_operand.vmem [shape: f32[1,32], index: 2, kind: input, shape index: {}]   ;;  %s258_s3 = inlined_call_operand.vmem [shape: f32[16,32], index: 3, kind: input, shape index: {}]   ;;  %s259_s4 = inlined_call_operand.vmem [shape: f32[1,32], index: 4, kind: input, shape index: {}]   ;;  %s260_s5 = inlined_call_operand.vmem [shape: f32[1,32], index: 5, kind: input, shape index: {}]   ;;  %s261_s6 = inlined_call_operand.vmem [shape: f32[16,32], index: 6, kind: output, shape index: {}]  }
   0x1   :  { %164 = vmatprep.subr.bf16.mxu0 %v181_v0  ;;  %v174_v1 = vld [vmem:[%s255_s1] sm:$0xff]   ;;  %168 = vmatprep.mubr.msk.bf16.mxu0 %vm182_vm0, %v181_v0  ;;  %v175_v2 = vld [vmem:[%s255_s1 + $0x8] sm:$0xff]  }
   0x2   :  { %165 = vmatpush3.bf16.msra.mxu0 %v174_v1  ;;  %v176_v3 = vld [vmem:[%s256_s0] sm:$0xff]   ;;  %v100_v10 = vld [vmem:[%s258_s3 + $0x8] sm:$0xff] }
   0x3   :  { %166 = vmatprep.subr.bf16.mxu0 %v181_v0  ;;  %v154_v4 = vld [vmem:[%s257_s2] ss:$0 sm:$0xff] }
   0x4   :  { %v99_v6 = vld [vmem:[%s258_s3] sm:$0xff] }
   0x5   :  { %v159_v34 = vld [vmem:[%s259_s4] ss:$0 sm:$0xff] }
   0x6   :  { %167 = vmatpush3.bf16.msra.mxu0 %v175_v2  ;;  %v160_v36 = vld [vmem:[%s260_s5] ss:$0 sm:$0xff] }
   0x9   :  { %169 = vmatmul.mubr.msk.bf16.vlgmr.msra.gmra.mrb[0].mxu0 %vm54_vm1, %v176_v3 }
  0xdc   :  { %v92_v5 = vpop.f32.mrb[0].mxu0 }
  0xdd   :  { %v93_v7 = vadd.f32 %v154_v4, %v92_v5  ;;  %v170_v8 = vpop.f32.mrb[1].mxu0 }
  0xde   :  { %v95_v9 = vpop.f32.mrb[2].mxu0 }
  0xdf   :  { %v96_v11 = vadd.f32 %v154_v4, %v95_v9  ;;  %v171_v12 = vpop.f32.mrb[3].mxu0  ;;  %v101_v13 = vadd.f32 %v99_v6, %v93_v7 }
  0xe1   :  { %v103_v14 = vsel %vm54_vm1, %v101_v13, 0.0  ;;  %v102_v15 = vadd.f32 %v100_v10, %v96_v11 }
  0xe2   :  { %104 = vadd.xlane.f32.xlu0 %v103_v14 }
  0xe3   :  { %v106_v16 = vsel %vm54_vm1, %v102_v15, 0.0 }
  0xe6   :  { %107 = vadd.xlane.f32.xlu0 %v106_v16 }
 0x16f   :  { %v105_v17 = vpop.xlane.xlu0 %104 }
 0x170   :  { %v110_v18 = vmul.f32 0.03125, %v105_v17 }
 0x172   :  { %v112_v19 = vsub.f32 %v101_v13, %v110_v18 }
 0x173   :  { %v108_v20 = vpop.xlane.xlu0 %107 }
 0x174   :  { %v111_v21 = vmul.f32 0.03125, %v108_v20  ;;  %v114_v22 = vmul.f32 %v112_v19, %v112_v19 }
 0x176   :  { %v113_v23 = vsub.f32 %v102_v15, %v111_v21  ;;  %v116_v24 = vsel %vm54_vm1, %v114_v22, 0.0 }
 0x177   :  { %117 = vadd.xlane.f32.xlu1 %v116_v24 }
 0x178   :  { %v115_v25 = vmul.f32 %v113_v23, %v113_v23 }
 0x17a   :  { %v119_v26 = vsel %vm54_vm1, %v115_v25, 0.0 }
 0x17b   :  { %120 = vadd.xlane.f32.xlu1 %v119_v26 }
 0x204   :  { %v118_v27 = vpop.xlane.xlu1 %117 }
 0x205   :  { %v122_v28 = vmul.f32 0.03125, %v118_v27 }
 0x207   :  { %v124_v29 = vadd.f32 1e-05, %v122_v28 }
 0x208   :  { %v121_v30 = vpop.xlane.xlu1 %120 }
 0x209   :  { %177 = vrsqrt.f32 %v124_v29  ;;  %v123_v31 = vmul.f32 0.03125, %v121_v30 }
 0x20b   :  { %v125_v32 = vadd.f32 1e-05, %v123_v31 }
 0x20d   :  { %179 = vrsqrt.f32 %v125_v32 }
 0x213   :  { %v178_v33 = vpop.eup %177 }
 0x214   :  { %v128_v35 = vmul.f32 %v178_v33, %v112_v19 }
 0x216   :  { %v137_v37 = vmul.f32 %v159_v34, %v128_v35 }
 0x217   :  { %v180_v38 = vpop.eup %179 }
 0x218   :  { %v146_v39 = vadd.f32 %v160_v36, %v137_v37  ;;  %v129_v40 = vmul.f32 %v180_v38, %v113_v23 }
 0x21a   :  { %148 = vst.msk [vmem:[%s261_s6] sm:$0xff] %vm54_vm1, %v146_v39  ;;  %v138_v41 = vmul.f32 %v159_v34, %v129_v40 }
 0x21c   :  { %v147_v42 = vadd.f32 %v160_v36, %v138_v41 }
 0x21e   :  { %149 = vst.msk [vmem:[%s261_s6 + $0x8] sm:$0xff] %vm54_vm1, %v147_v42 }

// kernel: transformer_forward.16
= control target key start
LH: loop header
LB: loop body
LE: loop exit
PB: predicated region body
PF: predicated region fallthrough
CT: control target
= control target key end

     0   :  { %v126_v0 = vmov 0.0   ;;  %vm127_vm0 = vmmov 0   ;;  %vm41_vm1 = vcmask 261120   ;;  %vm96_vm2 = vcmask 519168   ;;  %s169_s1 = inlined_call_operand.vmem [shape: bf16[32,64], index: 1, kind: input, shape index: {}]   ;;  %s170_s0 = inlined_call_operand.vmem [shape: f32[16,32], index: 0, kind: input, shape index: {}]   ;;  %s171_s2 = inlined_call_operand.vmem [shape: f32[1,64], index: 2, kind: input, shape index: {}]   ;;  %s172_s3 = inlined_call_operand.vmem [shape: bf16[16,64], index: 3, kind: output, shape index: {}]  }
   0x1   :  { %114 = vmatprep.subr.bf16.mxu0 %v126_v0  ;;  %v124_v1 = vld [vmem:[%s169_s1] sm:$0xff]   ;;  %118 = vmatprep.mubr.msk.bf16.mxu0 %vm127_vm0, %v126_v0  ;;  %v125_v2 = vld [vmem:[%s169_s1 + $0x8] sm:$0xff]  }
   0x2   :  { %115 = vmatpush3.bf16.msra.mxu0 %v124_v1  ;;  %v15_v3 = vld [vmem:[%s170_s0] sm:$0xff]  ;;  %v16_v4 = vld [vmem:[%s170_s0 + $0x8] sm:$0xff] }
   0x3   :  { %116 = vmatprep.subr.bf16.mxu0 %v126_v0  ;;  %v17_v5 = vpack.c.bf16 %v16_v4, %v15_v3  ;;  %v103_v6 = vld [vmem:[%s171_s2] ss:$0 sm:$0xff] }
   0x6   :  { %117 = vmatpush3.bf16.msra.mxu0 %v125_v2 }
   0x9   :  { %119 = vmatmul.mubr.msk.bf16.vlgmr.msra.gmra.mrb[0].mxu0 %vm41_vm1, %v17_v5 }
  0xdc   :  { %v79_v7 = vpop.f32.mrb[0].mxu0 }
  0xdd   :  { %v80_v8 = vadd.f32 %v103_v6, %v79_v7  ;;  %v120_v9 = vpop.f32.mrb[1].mxu0 }
  0xde   :  { %v82_v10 = vpop.f32.mrb[2].mxu0 }
  0xdf   :  { %v86_v11 = vmax.f32 %v80_v8, 0.0  ;;  %v83_v12 = vadd.f32 %v103_v6, %v82_v10  ;;  %v121_v13 = vpop.f32.mrb[3].mxu0 }
  0xe1   :  { %v109_v14 = vpack.c.bf16 %v86_v11, %v86_v11  ;;  %v87_v15 = vmax.f32 %v83_v12, 0.0 }
  0xe3   :  { %97 = vst.msk [vmem:[%s172_s3] sm:$0xf] %vm96_vm2, %v109_v14  ;;  %v110_v16 = vpack.c.bf16 %v87_v15, %v87_v15 }
  0xe5   :  { %98 = vst.msk [vmem:[%s172_s3 + $0x4] sm:$0xf] %vm96_vm2, %v110_v16 }

// kernel: transformer_forward.17
= control target key start
LH: loop header
LB: loop body
LE: loop exit
PB: predicated region body
PF: predicated region fallthrough
CT: control target
= control target key end

     0   :  { %v208_v0 = vmov 0.0   ;;  %vm209_vm0 = vmmov 0   ;;  %vm70_vm1 = vcmask 523264   ;;  %vm119_vm2 = vcmask 261120   ;;  %s287_s1 = inlined_call_operand.vmem [shape: bf16[64,32], index: 1, kind: input, shape index: {}]   ;;  %s288_s0 = inlined_call_operand.vmem [shape: bf16[16,64], index: 0, kind: input, shape index: {}]   ;;  %s289_s2 = inlined_call_operand.vmem [shape: f32[1,32], index: 2, kind: input, shape index: {}]   ;;  %s290_s3 = inlined_call_operand.vmem [shape: f32[16,32], index: 3, kind: input, shape index: {}]   ;;  %s291_s4 = inlined_call_operand.vmem [shape: f32[1,32], index: 4, kind: input, shape index: {}]   ;;  %s292_s5 = inlined_call_operand.vmem [shape: f32[1,32], index: 5, kind: input, shape index: {}]   ;;  %s293_s6 = inlined_call_operand.vmem [shape: f32[16,32], index: 6, kind: output, shape index: {}]  }
   0x1   :  { %185 = vmatprep.subr.bf16.mxu0 %v208_v0  ;;  %v199_v1 = vld [vmem:[%s287_s1] sm:$0xff]   ;;  %193 = vmatprep.mubr.msk.bf16.mxu0 %vm209_vm0, %v208_v0  ;;  %v200_v2 = vld [vmem:[%s287_s1 + $0x8] sm:$0xff]   ;;  %v201_v3 = vld [vmem:[%s287_s1 + $0x10] sm:$0xff]  }
   0x2   :  { %186 = vmatpush3.bf16.msra.mxu0 %v199_v1  ;;  %v202_v4 = vld [vmem:[%s287_s1 + $0x18] sm:$0xff]   ;;  %v203_v5 = vld [vmem:[%s288_s0] sm:$0xff]   ;;  %v116_v12 = vld [vmem:[%s290_s3 + $0x8] sm:$0xff] }
   0x3   :  { %187 = vmatprep.subr.bf16.mxu0 %v208_v0  ;;  %v171_v6 = vld [vmem:[%s289_s2] ss:$0 sm:$0xff] }
   0x4   :  { %v115_v8 = vld [vmem:[%s290_s3] sm:$0xff] }
   0x5   :  { %v178_v36 = vld [vmem:[%s291_s4] ss:$0 sm:$0xff] }
   0x6   :  { %188 = vmatpush3.bf16.msra.mxu0 %v200_v2  ;;  %v179_v38 = vld [vmem:[%s292_s5] ss:$0 sm:$0xff] }
   0x7   :  { %189 = vmatprep.subr.bf16.mxu0 %v208_v0 }
   0xa   :  { %190 = vmatpush3.bf16.msra.mxu0 %v201_v3 }
   0xb   :  { %191 = vmatprep.subr.bf16.mxu0 %v208_v0 }
   0xe   :  { %192 = vmatpush3.bf16.msra.mxu0 %v202_v4 }
  0x11   :  { %194 = vmatmul.mubr.msk.bf16.vlgmr.msra.gmra.mrb[0].mxu0 %vm70_vm1, %v203_v5 }
  0xe4   :  { %v108_v7 = vpop.f32.mrb[0].mxu0 }
  0xe5   :  { %v109_v9 = vadd.f32 %v171_v6, %v108_v7  ;;  %v195_v10 = vpop.f32.mrb[1].mxu0 }
  0xe6   :  { %v111_v11 = vpop.f32.mrb[2].mxu0 }
  0xe7   :  { %v112_v13 = vadd.f32 %v171_v6, %v111_v11  ;;  %v196_v14 = vpop.f32.mrb[3].mxu0  ;;  %v117_v15 = vadd.f32 %v115_v8, %v109_v9 }
  0xe9   :  { %v120_v16 = vsel %vm119_vm2, %v117_v15, 0.0  ;;  %v118_v17 = vadd.f32 %v116_v12, %v112_v13 }
  0xea   :  { %121 = vadd.xlane.f32.xlu0 %v120_v16 }
  0xeb   :  { %v123_v18 = vsel %vm119_vm2, %v118_v17, 0.0 }
  0xee   :  { %124 = vadd.xlane.f32.xlu0 %v123_v18 }
 0x177   :  { %v122_v19 = vpop.xlane.xlu0 %121 }
 0x178   :  { %v127_v20 = vmul.f32 0.03125, %v122_v19 }
 0x17a   :  { %v129_v21 = vsub.f32 %v117_v15, %v127_v20 }
 0x17b   :  { %v125_v22 = vpop.xlane.xlu0 %124 }
 0x17c   :  { %v128_v23 = vmul.f32 0.03125, %v125_v22  ;;  %v131_v24 = vmul.f32 %v129_v21, %v129_v21 }
 0x17e   :  { %v130_v25 = vsub.f32 %v118_v17, %v128_v23  ;;  %v133_v26 = vsel %vm119_vm2, %v131_v24, 0.0 }
 0x17f   :  { %134 = vadd.xlane.f32.xlu1 %v133_v26 }
 0x180   :  { %v132_v27 = vmul.f32 %v130_v25, %v130_v25 }
 0x182   :  { %v136_v28 = vsel %vm119_vm2, %v132_v27, 0.0 }
 0x183   :  { %137 = vadd.xlane.f32.xlu1 %v136_v28 }
 0x20c   :  { %v135_v29 = vpop.xlane.xlu1 %134 }
 0x20d   :  { %v139_v30 = vmul.f32 0.03125, %v135_v29 }
 0x20f   :  { %v141_v31 = vadd.f32 1e-05, %v139_v30 }
 0x210   :  { %v138_v32 = vpop.xlane.xlu1 %137 }
 0x211   :  { %204 = vrsqrt.f32 %v141_v31  ;;  %v140_v33 = vmul.f32 0.03125, %v138_v32 }
 0x213   :  { %v142_v34 = vadd.f32 1e-05, %v140_v33 }
 0x215   :  { %206 = vrsqrt.f32 %v142_v34 }
 0x21b   :  { %v205_v35 = vpop.eup %204 }
 0x21c   :  { %v145_v37 = vmul.f32 %v205_v35, %v129_v21 }
 0x21e   :  { %v154_v39 = vmul.f32 %v178_v36, %v145_v37 }
 0x21f   :  { %v207_v40 = vpop.eup %206 }
 0x220   :  { %v163_v41 = vadd.f32 %v179_v38, %v154_v39  ;;  %v146_v42 = vmul.f32 %v207_v40, %v130_v25 }
 0x222   :  { %165 = vst.msk [vmem:[%s293_s6] sm:$0xff] %vm119_vm2, %v163_v41  ;;  %v155_v43 = vmul.f32 %v178_v36, %v146_v42 }
 0x224   :  { %v164_v44 = vadd.f32 %v179_v38, %v155_v43 }
 0x226   :  { %166 = vst.msk [vmem:[%s293_s6 + $0x8] sm:$0xff] %vm119_vm2, %v164_v44 }

// kernel: transformer_forward.23
= control target key start
LH: loop header
LB: loop body
LE: loop exit
PB: predicated region body
PF: predicated region fallthrough
CT: control target
= control target key end

     0   :  { %v151_v1 = vmov 0.0   ;;  %vm152_vm0 = vmmov 0   ;;  %s203_s0 = inlined_call_operand.vmem [shape: f32[16,32], index: 0, kind: input, shape index: {}]   ;;  %s204_s1 = inlined_call_operand.vmem [shape: bf16[32,32], index: 1, kind: input, shape index: {}]   ;;  %s205_s2 = inlined_call_operand.vmem [shape: f32[1,32], index: 2, kind: input, shape index: {}]   ;;  %s206_s3 = inlined_call_operand.hbm [shape: f32[16,32], index: 3, kind: output, shape index: {}]  }
   0x1   :  { %v125_v0 = vld [vmem:[%s204_s1] sm:$0xff]   ;;  %112 = vmatprep.subr.bf16.mxu0 %v151_v1  ;;  %v126_v2 = vld [vmem:[%s204_s1 + $0x8] sm:$0xff]   ;;  %116 = vmatprep.mubr.msk.bf16.mxu0 %vm152_vm0, %v151_v1 }
   0x2   :  { %113 = vmatpush3.bf16.msra.mxu0 %v125_v0  ;;  %v16_v3 = vld [vmem:[%s203_s0] sm:$0xff]  ;;  %v17_v4 = vld [vmem:[%s203_s0 + $0x8] sm:$0xff] }
   0x3   :  { %114 = vmatprep.subr.bf16.mxu0 %v151_v1 }
   0x4   :  { %8 = vsyncpa [#allocation3], 0  ;;  %v18_v5 = vpack.c.bf16 %v17_v4, %v16_v3  ;;  %vm42_vm1 = vcmask 261120   ;;  %v105_v6 = vld [vmem:[%s205_s2] ss:$0 sm:$0xff]  ;;  %s153_s1 = smov [#allocation2]  }
   0x5   :  { %s94_s22 = sshll.u32 %s153_s1, 4  ;;  %s95_s22 = int_to_ptr.vmem [resolvable:$true] %s94_s22 }
   0x6   :  { %115 = vmatpush3.bf16.msra.mxu0 %v126_v2  ;;  %s127_s0 = scalar_lea.vmem %s95_s22, 256  ;;  %p132_p1 = scmp.lt.s32.totalorder %s95_s22, %s95_s22 }
   0x7   :  { %p128_p0 = scmp.ne.s32.totalorder %s95_s22, %s127_s0  ;;  %p133_p2 = scmp.lt.s32.totalorder %s127_s0, %s127_s0 }
   0x9   :  { %117 = vmatmul.mubr.msk.bf16.vlgmr.msra.gmra.mrb[0].mxu0 %vm42_vm1, %v18_v5  ;;  %p134_p3 = por %p133_p2, %p132_p1 }
   0xb   :  { %p135_p4 = pnand %p134_p3, %p128_p0 }
  0xdc   :  { %v80_v7 = vpop.f32.mrb[0].mxu0 }
  0xdd   :  { %v81_v8 = vadd.f32 %v105_v6, %v80_v7  ;;  %v118_v9 = vpop.f32.mrb[1].mxu0 }
  0xde   :  { %v83_v10 = vpop.f32.mrb[2].mxu0 }
  0xdf   :  { %87 = vst.msk [vmem:[#allocation2] sm:$0xff] %vm42_vm1, %v81_v8  ;;  %v84_v11 = vadd.f32 %v105_v6, %v83_v10  ;;  %v119_v12 = vpop.f32.mrb[3].mxu0 }
  0xe1   :  { %88 = vst.msk [vmem:[#allocation2 + $0x8] sm:$0xff] %vm42_vm1, %v84_v11 }
  0xe2   :  { %138 = shalt.err (!%p135_p4)
}
  0xe3   :  { %s139_s24 = scalar_lea.hbm %s206_s3, 256 }
  0xe4   :  { %p140_p5 = scmp.ne.s32.totalorder %s206_s3, %s139_s24  ;;  %p143_p6 = scmp.lt.u32.totalorder %s139_s24, %s206_s3 }
  0xe6   :  { %p145_p7 = pnand %p143_p6, %p140_p5 }
  0xe8   :  { %148 = shalt.err (!%p145_p7)
}
  0xe9   :  { %s154_s29 = smov 128   ;;  %s155_s30 = smov 8  }
  0xea   :  { %100 = dma.vmem_to_hbm [thread:$0]  %s95_s22, 256, %s206_s3, [#allocation3], %s154_s29, %s154_s29, %s155_s30  }
  0xeb   :  { %149 = dma.done.wait [#allocation3], 256  }
  0xec   :  { %150 = vsyncadd [#allocation3], 4294967040 }
  0xed   :  { %104 = vsyncpa [#allocation3], 1 }

// kernel: transformer_forward.14
= control target key start
LH: loop header
LB: loop body
LE: loop exit
PB: predicated region body
PF: predicated region fallthrough
CT: control target
= control target key end

     0   :  { %s2284_s12 = smov 0   ;;  %s2286_s13 = smov 0   ;;  %s2905_s0 = inlined_call_operand.vmem [shape: bf16[8,2,3,4,8], index: 0, kind: input, shape index: {}, may-alias: {0,1,2}]   ;;  %s2906_s1 = inlined_call_operand.vmem [shape: bf16[8,2,3,4,8], index: 1, kind: input, shape index: {}, may-alias: {0,1,2}]   ;;  %s2907_s2 = inlined_call_operand.vmem [shape: bf16[8,2,3,4,8], index: 2, kind: input, shape index: {}, may-alias: {0,1,2}]   ;;  %s2908_s3 = inlined_call_operand.vmem [shape: bf16[8,2,4,8], index: 3, kind: output, shape index: {}]  }
   0x1   :  { %s2288_s14 = smov 0   ;;  %s2290_s15 = smov 0  }
   0x2   :  { %s2292_s16 = smov 0  }
   0x3 LB: > { %s25_s17 = sadd.s32 1, %s2254_s15  ;;  %s2012_s18 = sadd.s32 4294967295, %s2258_s16   ;;  %s2258_s16 = sphi %s2292_s16, %s13_s16   ;;  %s2254_s15 = sphi %s2290_s15, %s2922_s15   ;;  %s2250_s14 = sphi %s2288_s14, %s2921_s14   ;;  %s2246_s13 = sphi %s2286_s13, %s2920_s13   ;;  %s2242_s12 = sphi %s2284_s12, %s2919_s12  }
   0x4   : > { %p27_p0 = scmp.ge.s32.totalorder %s25_s17, 2  ;;  %p41_p1 = scmp.ne.s32.totalorder %s2246_s13, %s2242_s12 }
   0x5   : > { %p42_p2 = scmp.eq.s32.totalorder %s2258_s16, 0  ;;  %p129_p4 = scmp.eq.s32.totalorder %s2012_s18, 1 }
   0x6   : > { %s2924_s17 = smov (%p27_p0, %s25_s17), 0  ;;  %s34_s21 = sadd.s32 1, %s2246_s13 }
   0x7   : > { %p2316_p3 = por %p42_p2, %p41_p1  ;;  %s29_s20 = ssub.s32 %s2254_s15, %s2924_s17 }
   0x8   : > { %p32_p5 = scmp.eq.s32.totalorder %s29_s20, 0  ;;  %p2323_p6 = por %p129_p4, %p41_p1 }
   0x9   : > { %p2015_p7 = scmp.ge.s32.totalorder %s2258_s16, 2 }
   0xa   : > { %s2328_s23 = scalar_select %p32_p5, %s2246_s13, %s34_s21  }
   0xb   : > { %151 = sbr.rel (%p2015_p7) target bundleno = 48 (0x30), region = 16 }
  0x12   : > { %154 = sbr.rel (!%p2316_p3) target bundleno = 28 (0x1c), region = 20  ;;  %s156_s24 = sand.u32 (%p2316_p3), 1, %s2246_s13  }
  0x13   : > { %s2159_s25 = smul.u32 (%p2316_p3), 6, %s2254_s15  ;;  %s2016_s26 = sshll.u32 (%p2316_p3), %s156_s24, 4 }
  0x14   : > { %s158_s30 = scalar_lea.vmem (%p2316_p3), [#allocation2], %s2016_s26 }
  0x15   : > { %s162_s29 = scalar_lea.vmem (%p2316_p3), %s2905_s0, %s2159_s25 }
  0x16   : > { %v178_v0 = vld [vmem:[%s162_s29] sm:$0x3] (%p2316_p3)  ;;  %v180_v1 = vld [vmem:[%s162_s29 + $0xc] sm:$0x3] (%p2316_p3)  ;;  %v182_v2 = vld [vmem:[%s162_s29 + $0x18] sm:$0x3] (%p2316_p3) }
  0x17   : > { %179 = vst [vmem:[%s158_s30] sm:$0x3] (%p2316_p3), %v178_v0  ;;  %181 = vst [vmem:[%s158_s30 + $0x2] sm:$0x3] (%p2316_p3), %v180_v1  ;;  %v184_v3 = vld [vmem:[%s162_s29 + $0x24] sm:$0x3] (%p2316_p3) }
  0x18   : > { %183 = vst [vmem:[%s158_s30 + $0x4] sm:$0x3] (%p2316_p3), %v182_v2  ;;  %v186_v4 = vld [vmem:[%s162_s29 + $0x30] sm:$0x3] (%p2316_p3)  ;;  %v188_v5 = vld [vmem:[%s162_s29 + $0x3c] sm:$0x3] (%p2316_p3) }
  0x19   : > { %185 = vst [vmem:[%s158_s30 + $0x6] sm:$0x3] %v184_v3  ;;  %187 = vst [vmem:[%s158_s30 + $0x8] sm:$0x3] %v186_v4  ;;  %v190_v6 = vld [vmem:[%s162_s29 + $0x48] sm:$0x3] }
  0x1a   : > { %189 = vst [vmem:[%s158_s30 + $0xa] sm:$0x3] %v188_v5  ;;  %v192_v7 = vld [vmem:[%s162_s29 + $0x54] sm:$0x3]  ;;  %191 = vst [vmem:[%s158_s30 + $0xc] sm:$0x3] %v190_v6 }
  0x1b   : > { %193 = vst [vmem:[%s158_s30 + $0xe] sm:$0x3] %v192_v7 }
  0x1c PF: > { %232 = sbr.rel (!%p2316_p3) target bundleno = 38 (0x26), region = 61  ;;  %s234_s4 = sand.u32 (%p2316_p3), 1, %s2246_s13  }
  0x1d   : > { %s2019_s5 = smul.u32 (%p2316_p3), 6, %s2254_s15  ;;  %s2018_s6 = sshll.u32 (%p2316_p3), %s234_s4, 4 }
  0x1e   : > { %s236_s10 = scalar_lea.vmem (%p2316_p3), [#allocation3], %s2018_s6 }
  0x1f   : > { %s1925_s9 = scalar_lea.vmem (%p2316_p3), %s2906_s1, %s2019_s5 }
  0x20   : > { %v2020_v8 = vld [vmem:[%s1925_s9 + $0x2] sm:$0x3] (%p2316_p3)  ;;  %v2021_v9 = vld [vmem:[%s1925_s9 + $0xe] sm:$0x3] (%p2316_p3)  ;;  %v2022_v10 = vld [vmem:[%s1925_s9 + $0x1a] sm:$0x3] (%p2316_p3) }
  0x21   : > { %258 = vst [vmem:[%s236_s10] sm:$0x3] (%p2316_p3), %v2020_v8  ;;  %260 = vst [vmem:[%s236_s10 + $0x2] sm:$0x3] (%p2316_p3), %v2021_v9  ;;  %v2023_v11 = vld [vmem:[%s1925_s9 + $0x26] sm:$0x3] (%p2316_p3) }
  0x22   : > { %262 = vst [vmem:[%s236_s10 + $0x4] sm:$0x3] (%p2316_p3), %v2022_v10  ;;  %v2024_v12 = vld [vmem:[%s1925_s9 + $0x32] sm:$0x3] (%p2316_p3)  ;;  %v2025_v13 = vld [vmem:[%s1925_s9 + $0x3e] sm:$0x3] (%p2316_p3) }
  0x23   : > { %264 = vst [vmem:[%s236_s10 + $0x6] sm:$0x3] %v2023_v11  ;;  %266 = vst [vmem:[%s236_s10 + $0x8] sm:$0x3] %v2024_v12  ;;  %v2026_v14 = vld [vmem:[%s1925_s9 + $0x4a] sm:$0x3] }
  0x24   : > { %268 = vst [vmem:[%s236_s10 + $0xa] sm:$0x3] %v2025_v13  ;;  %v2027_v15 = vld [vmem:[%s1925_s9 + $0x56] sm:$0x3]  ;;  %270 = vst [vmem:[%s236_s10 + $0xc] sm:$0x3] %v2026_v14 }
  0x25   : > { %272 = vst [vmem:[%s236_s10 + $0xe] sm:$0x3] %v2027_v15 }
  0x26 PF: > { %311 = sbr.rel (!%p2316_p3) target bundleno = 48 (0x30), region = 102  ;;  %s313_s11 = sand.u32 (%p2316_p3), 1, %s2246_s13  }
  0x27   : > { %s2029_s18 = smul.u32 (%p2316_p3), 6, %s2254_s15  ;;  %s2028_s20 = sshll.u32 (%p2316_p3), %s313_s11, 4 }
  0x28   : > { %s315_s26 = scalar_lea.vmem (%p2316_p3), [#allocation4], %s2028_s20 }
  0x29   : > { %s1932_s25 = scalar_lea.vmem (%p2316_p3), %s2907_s2, %s2029_s18 }
  0x2a   : > { %v2030_v16 = vld [vmem:[%s1932_s25 + $0x4] sm:$0x3] (%p2316_p3)  ;;  %v2031_v17 = vld [vmem:[%s1932_s25 + $0x10] sm:$0x3] (%p2316_p3)  ;;  %v2032_v18 = vld [vmem:[%s1932_s25 + $0x1c] sm:$0x3] (%p2316_p3) }
  0x2b   : > { %337 = vst [vmem:[%s315_s26] sm:$0x3] (%p2316_p3), %v2030_v16  ;;  %339 = vst [vmem:[%s315_s26 + $0x2] sm:$0x3] (%p2316_p3), %v2031_v17  ;;  %v2033_v19 = vld [vmem:[%s1932_s25 + $0x28] sm:$0x3] (%p2316_p3) }
  0x2c   : > { %341 = vst [vmem:[%s315_s26 + $0x4] sm:$0x3] (%p2316_p3), %v2032_v18  ;;  %v2034_v20 = vld [vmem:[%s1932_s25 + $0x34] sm:$0x3] (%p2316_p3)  ;;  %v2035_v21 = vld [vmem:[%s1932_s25 + $0x40] sm:$0x3] (%p2316_p3) }
  0x2d   : > { %343 = vst [vmem:[%s315_s26 + $0x6] sm:$0x3] %v2033_v19  ;;  %345 = vst [vmem:[%s315_s26 + $0x8] sm:$0x3] %v2034_v20  ;;  %v2036_v22 = vld [vmem:[%s1932_s25 + $0x4c] sm:$0x3] }
  0x2e   : > { %347 = vst [vmem:[%s315_s26 + $0xa] sm:$0x3] %v2035_v21  ;;  %v2037_v23 = vld [vmem:[%s1932_s25 + $0x58] sm:$0x3]  ;;  %349 = vst [vmem:[%s315_s26 + $0xc] sm:$0x3] %v2036_v22 }
  0x2f   : > { %351 = vst [vmem:[%s315_s26 + $0xe] sm:$0x3] %v2037_v23 }
  0x30 PF: > { %p2038_p8 = scmp.ge.s32.totalorder %s2258_s16, 1  ;;  %p389_p9 = scmp.lt.s32.totalorder %s2258_s16, 3 }
  0x32   : > { %p390_p10 = pnand %p2038_p8, %p389_p9 }
  0x33   : > { %s396_s19 = sand.u32 (!%p390_p10), 1, %s2242_s12   ;;  %v2260_v24 = vmov (!%p390_p10), 0.0   ;;  %vm2261_vm0 = vmmov (!%p390_p10), 0   ;;  %vm543_vm1 = vcmask (!%p390_p10), 1041409   ;;  %vm546_vm2 = vcmask (!%p390_p10), 1042434  }
  0x34   : > { %393 = sbr.rel (%p390_p10) target bundleno = 1093 (0x445), region = 143  ;;  %2111 = vmatprep.subr.bf16.mxu0 (!%p390_p10), %v2260_v24  ;;  %s2356_s27 = sshll.u32 (!%p390_p10), %s396_s19, 4  ;;  %2117 = vmatprep.subr.bf16.mxu1 (!%p390_p10), %v2260_v24  ;;  %vm549_vm3 = vcmask (!%p390_p10), 1043459   ;;  %vm552_vm4 = vcmask (!%p390_p10), 1044484   ;;  %vm555_vm5 = vcmask (!%p390_p10), 1045509   ;;  %vm558_vm6 = vcmask (!%p390_p10), 1046534  }
  0x35   : > { %s405_s28 = scalar_lea.vmem (!%p390_p10), [#allocation3], %s2356_s27  ;;  %2113 = vmatprep.mubr.msk.bf16.mxu0 (!%p390_p10), %vm2261_vm0, %v2260_v24  ;;  %2119 = vmatprep.mubr.msk.bf16.mxu1 (!%p390_p10), %vm2261_vm0, %v2260_v24  ;;  %s398_s12 = scalar_lea.vmem (!%p390_p10), [#allocation2], %s2356_s27  ;;  %vm561_vm7 = vcmask (!%p390_p10), 1047559   ;;  %vm651_vm8 = vcmask (!%p390_p10), 64512   ;;  %vm799_vm10 = vcmask (!%p390_p10), 1043456   ;;  %vm951_vm11 = vcmask (!%p390_p10), 57344  }
  0x36   : > { %v2051_v25 = vld.sshfl [vmem:[%s405_s28] sm:$0x3 pattern:$0x76325410] (!%p390_p10)  ;;  %s412_s29 = scalar_lea.vmem (!%p390_p10), [#allocation4], %s2356_s27  ;;  %s2685_s30 = scalar_lea.vmem (!%p390_p10), [#allocation5], %s2356_s27 }
  0x37   : > { %v2052_v26 = vld.sshfl [vmem:[%s405_s28 + $0x2] sm:$0x3 pattern:$0x76325410] (!%p390_p10)  ;;  %v2364_v28 = vunpack.c.l.b16 (!%p390_p10), %v2051_v25  ;;  %v465_v25 = vlaneseq (!%p390_p10)  ;;  %vm952_vm12 = vsmask.f32 (!%p390_p10), 256 }
  0x38   : > { %v2053_v27 = vld.sshfl [vmem:[%s405_s28 + $0x4] sm:$0x3 pattern:$0x76325410] (!%p390_p10)  ;;  %v2366_v29 = vunpack.c.l.b16 (!%p390_p10), %v2052_v26  ;;  %vm2680_vm13 = vmand (!%p390_p10), %vm951_vm11, %vm952_vm12  ;;  %vm1234_vm14 = vsmask.f32 (!%p390_p10), 7938 }
  0x39   : > { %v2054_v30 = vld.sshfl [vmem:[%s405_s28 + $0x6] sm:$0x3 pattern:$0x76325410] (!%p390_p10)  ;;  %v2368_v31 = vunpack.c.l.b16 (!%p390_p10), %v2053_v27  ;;  %v2432_v26 = vshrl.u32 (!%p390_p10), %v465_v25, 7  ;;  %v2434_v27 = vand.u32 (!%p390_p10), 127, %v465_v25  ;;  %vm2735_vm15 = vmand (!%p390_p10), %vm951_vm11, %vm1234_vm14 }
  0x3a   : > { %v2055_v32 = vld.sshfl [vmem:[%s405_s28 + $0x8] sm:$0x3 pattern:$0x76325410] (!%p390_p10)  ;;  %v2370_v33 = vunpack.c.l.b16 (!%p390_p10), %v2054_v30  ;;  %v636_v34 = vrot.slane (!%p390_p10), %v2366_v29, 7 }
  0x3b   : > { %v2056_v35 = vld.sshfl [vmem:[%s405_s28 + $0xa] sm:$0x3 pattern:$0x76325410]  ;;  %v2373_v36 = vunpack.c.l.b16 %v2055_v32  ;;  %v638_v37 = vrot.slane %v2368_v31, 6  ;;  %vm469_vm9 = vcmp.le.s32.totalorder %v2434_v27, %v2432_v26  ;;  %s2092_s4 = sshll.u32 (%p2323_p6), %s2250_s14, 1 }
  0x3c   : > { %v2057_v38 = vld.sshfl [vmem:[%s405_s28 + $0xc] sm:$0x3 pattern:$0x76325410]  ;;  %v2376_v39 = vunpack.c.l.b16 %v2056_v35  ;;  %v637_v40 = vsel %vm543_vm1, %v636_v34, %v2364_v28  ;;  %v640_v41 = vrot.slane %v2370_v33, 5  ;;  %s1834_s7 = scalar_lea.vmem (%p2323_p6), %s2908_s3, %s2092_s4 }
  0x3d   : > { %v2058_v42 = vld.sshfl [vmem:[%s405_s28 + $0xe] sm:$0x3 pattern:$0x76325410]  ;;  %v2381_v43 = vunpack.c.l.b16 %v2057_v38  ;;  %v639_v44 = vsel %vm546_vm2, %v638_v37, %v637_v40  ;;  %v642_v45 = vrot.slane %v2373_v36, 4 }
  0x3e   : > { %v2385_v46 = vunpack.c.l.b16 %v2058_v42  ;;  %v641_v47 = vsel %vm549_vm3, %v640_v41, %v639_v44  ;;  %v644_v48 = vrot.slane %v2376_v39, 3  ;;  %v2043_v49 = vld.sshfl [vmem:[%s398_s12] sm:$0x3 pattern:$0x76325410] }
  0x3f   : > { %v643_v50 = vsel %vm552_vm4, %v642_v45, %v641_v47  ;;  %v646_v51 = vrot.slane %v2381_v43, 2  ;;  %v2044_v52 = vld.sshfl [vmem:[%s398_s12 + $0x2] sm:$0x3 pattern:$0x76325410]  ;;  %v2394_v56 = vunpack.c.l.b16 %v2043_v49 }
  0x40   : > { %v645_v53 = vsel %vm555_vm5, %v644_v48, %v643_v50  ;;  %v648_v54 = vrot.slane %v2385_v46, 1  ;;  %v2045_v55 = vld.sshfl [vmem:[%s398_s12 + $0x4] sm:$0x3 pattern:$0x76325410]  ;;  %v2396_v57 = vunpack.c.l.b16 %v2044_v52 }
  0x41   : > { %v647_v58 = vsel %vm558_vm6, %v646_v51, %v645_v53  ;;  %v2046_v59 = vld.sshfl [vmem:[%s398_s12 + $0x6] sm:$0x3 pattern:$0x76325410]  ;;  %v2399_v60 = vunpack.c.l.b16 %v2045_v55 }
  0x42   : > { %v649_v61 = vsel %vm561_vm7, %v648_v54, %v647_v58  ;;  %v2047_v62 = vld.sshfl [vmem:[%s398_s12 + $0x8] sm:$0x3 pattern:$0x76325410]  ;;  %v2402_v63 = vunpack.c.l.b16 %v2046_v59  ;;  %v542_v0 = vrot.slane %v2396_v57, 7 }
  0x43   : > { %v650_v1 = vpack.c.b16 %v649_v61, %v649_v61  ;;  %v2048_v2 = vld.sshfl [vmem:[%s398_s12 + $0xa] sm:$0x3 pattern:$0x76325410]  ;;  %v2405_v3 = vunpack.c.l.b16 %v2047_v62  ;;  %v545_v4 = vrot.slane %v2399_v60, 6 }
  0x44   : > { %v2049_v5 = vld.sshfl [vmem:[%s398_s12 + $0xc] sm:$0x3 pattern:$0x76325410]  ;;  %v2408_v6 = vunpack.c.l.b16 %v2048_v2  ;;  %v544_v7 = vsel %vm543_vm1, %v542_v0, %v2394_v56  ;;  %v548_v8 = vrot.slane %v2402_v63, 5 }
  0x45   : > { %v656_v9 = vsel %vm651_vm8, %v650_v1, 0  ;;  %v2050_v10 = vld.sshfl [vmem:[%s398_s12 + $0xe] sm:$0x3 pattern:$0x76325410]  ;;  %v2414_v11 = vunpack.c.l.b16 %v2049_v5  ;;  %v547_v12 = vsel %vm546_vm2, %v545_v4, %v544_v7  ;;  %v551_v13 = vrot.slane %v2405_v3, 4 }
  0x46   : > { %2112 = vmatpush3.bf16.xpose.msra.mxu0 %v656_v9  ;;  %v2418_v14 = vunpack.c.l.b16 %v2050_v10  ;;  %v550_v15 = vsel %vm549_vm3, %v548_v8, %v547_v12  ;;  %v554_v16 = vrot.slane %v2408_v6, 3  ;;  %v2061_v40 = vld.sshfl [vmem:[%s412_s29 + $0x2] sm:$0x3 pattern:$0x76325410] }
  0x47   : > { %v553_v17 = vsel %vm552_vm4, %v551_v13, %v550_v15  ;;  %v557_v18 = vrot.slane %v2414_v11, 2  ;;  %2129 = vmatprep.subr.bf16.mxu0 %v2260_v24  ;;  %v2062_v41 = vld.sshfl [vmem:[%s412_s29 + $0x4] sm:$0x3 pattern:$0x76325410]  ;;  %v2446_v42 = vunpack.c.l.b16 %v2061_v40  ;;  %v980_v40 = vrot.slane %v2399_v60, 7 }
  0x48   : > { %v556_v19 = vsel %vm555_vm5, %v554_v16, %v553_v17  ;;  %v560_v20 = vrot.slane %v2418_v14, 1  ;;  %v2060_v44 = vld.sshfl [vmem:[%s412_s29] sm:$0x3 pattern:$0x76325410]  ;;  %v2448_v45 = vunpack.c.l.b16 %v2062_v41 }
  0x49   : > { %v559_v21 = vsel %vm558_vm6, %v557_v18, %v556_v19  ;;  %v2063_v47 = vld.sshfl [vmem:[%s412_s29 + $0x6] sm:$0x3 pattern:$0x76325410]  ;;  %v2450_v48 = vunpack.c.l.b16 %v2060_v44  ;;  %v781_v49 = vrot.slane %v2446_v42, 7  ;;  %v993_v18 = vrot.slane %v2364_v28, 1 }
  0x4a   : > { %v562_v22 = vsel %vm561_vm7, %v560_v20, %v559_v21  ;;  %v2064_v50 = vld.sshfl [vmem:[%s412_s29 + $0x8] sm:$0x3 pattern:$0x76325410]  ;;  %v2453_v51 = vunpack.c.l.b16 %v2063_v47  ;;  %v783_v52 = vrot.slane %v2448_v45, 6  ;;  %v995_v19 = vrot.slane %v2368_v31, 7 }
  0x4b   : > { %v563_v23 = vpack.c.b16 %v562_v22, %v562_v22  ;;  %v2065_v53 = vld.sshfl [vmem:[%s412_s29 + $0xa] sm:$0x3 pattern:$0x76325410]  ;;  %v2456_v54 = vunpack.c.l.b16 %v2064_v50  ;;  %v782_v55 = vsel %vm543_vm1, %v781_v49, %v2450_v48  ;;  %v994_v20 = vsel %vm543_vm1, %v2366_v29, %v993_v18 }
  0x4c   : > { %v2066_v58 = vld.sshfl [vmem:[%s412_s29 + $0xc] sm:$0x3 pattern:$0x76325410]  ;;  %v2460_v59 = vunpack.c.l.b16 %v2065_v53  ;;  %v784_v61 = vsel %vm546_vm2, %v783_v52, %v782_v55  ;;  %v785_v62 = vrot.slane %v2453_v51, 5  ;;  %v997_v21 = vrot.slane %v2370_v33, 6 }
  0x4d   : > { %2114 = vmatmul.mubr.msk.bf16.vlgmr.msra.gmra.mrb[0].mxu0 %vm651_vm8, %v563_v23  ;;  %v2067_v0 = vld.sshfl [vmem:[%s412_s29 + $0xe] sm:$0x3 pattern:$0x76325410]  ;;  %v2464_v1 = vunpack.c.l.b16 %v2066_v58  ;;  %v787_v2 = vrot.slane %v2456_v54, 4  ;;  %v996_v22 = vsel %vm546_vm2, %v995_v19, %v994_v20  ;;  %v999_v23 = vrot.slane %v2373_v36, 5 }
  0x4e   : > { %2131 = vmatprep.mubr.msk.bf16.mxu0 %vm2261_vm0, %v2260_v24  ;;  %v2467_v4 = vunpack.c.l.b16 %v2067_v0  ;;  %v786_v5 = vsel %vm549_vm3, %v785_v62, %v784_v61  ;;  %v789_v7 = vrot.slane %v2460_v59, 3  ;;  %v998_v25 = vsel %vm549_vm3, %v997_v21, %v996_v22 }
  0x4f   : > { %v788_v8 = vsel %vm552_vm4, %v787_v2, %v786_v5  ;;  %v791_v9 = vrot.slane %v2464_v1, 2  ;;  %v1003_v47 = vrot.slane %v2381_v43, 3  ;;  %v1279_v53 = vrot.slane %v2370_v33, 7 }
  0x50   : > { %v790_v10 = vsel %vm555_vm5, %v789_v7, %v788_v8  ;;  %v793_v12 = vrot.slane %v2467_v4, 1  ;;  %v982_v55 = vrot.slane %v2402_v63, 6  ;;  %v1558_v0 = vrot.slane %v2364_v28, 3 }
  0x51   : > { %v792_v13 = vsel %vm558_vm6, %v791_v9, %v790_v10  ;;  %v1559_v2 = vrot.slane %v2366_v29, 2  ;;  %v984_v7 = vrot.slane %v2405_v3, 5  ;;  %v1281_v8 = vrot.slane %v2373_v36, 6 }
  0x52   : > { %v794_v15 = vsel %vm561_vm7, %v793_v12, %v792_v13  ;;  %v1260_v10 = vrot.slane %v2394_v56, 2  ;;  %v1261_v12 = vrot.slane %v2396_v57, 1  ;;  %v1285_v21 = vrot.slane %v2381_v43, 4 }
  0x53   : > { %v795_v16 = vpack.c.b16 %v794_v15, %v794_v15  ;;  %v1560_v15 = vsel %vm543_vm1, %v1559_v2, %v1558_v0  ;;  %v1069_v27 = vrot.slane %v2453_v51, 6 }
  0x54   : > { %v1262_v20 = vsel %vm543_vm1, %v1261_v12, %v1260_v10  ;;  %v1570_v10 = vrot.slane %v2385_v46, 4 }
  0x55   : > { %v801_v17 = vsel %vm799_vm10, %v795_v16, 0 }
  0x56   : > { %2118 = vmatpush3.bf16.msra.mxu1 %v801_v17  ;;  %v986_v17 = vrot.slane %v2408_v6, 4 }
  0x57   : > { %2123 = vmatprep.subr.bf16.mxu1 %v2260_v24 }
 0x120   : > { %v692_v30 = vpop.f32.mrb[0].mxu0 }
 0x121   : > { %v2441_v32 = vsel %vm469_vm9, %v692_v30, -inf  ;;  %v2115_v34 = vpop.f32.mrb[1].mxu0  ;;  %v1275_v30 = vrot.slane %v2364_v28, 2  ;;  %v1561_v28 = vrot.slane %v2368_v31, 1 }
 0x122   : > { %v695_v35 = vpop.f32.mrb[2].mxu0  ;;  %v699_v37 = vsel %vm651_vm8, %v2441_v32, -inf  ;;  %v1276_v34 = vrot.slane %v2366_v29, 1  ;;  %v1283_v29 = vrot.slane %v2376_v39, 5 }
 0x123   : > { %700 = vmax.xlane.f32.xlu0 %v699_v37  ;;  %v2116_v38 = vpop.f32.mrb[3].mxu0  ;;  %v978_v35 = vrot.slane %v2394_v56, 1  ;;  %v1001_v37 = vrot.slane %v2376_v39, 4  ;;  %v1562_v22 = vsel %vm546_vm2, %v1561_v28, %v1560_v15  ;;  %v1272_v28 = vrot.slane %v2418_v14, 3 }
 0x124   : > { %v1000_v38 = vsel %vm552_vm4, %v999_v23, %v998_v25  ;;  %v1277_v41 = vsel %vm543_vm1, %v1276_v34, %v1275_v30  ;;  %v1264_v25 = vrot.slane %v2402_v63, 7  ;;  %v988_v34 = vrot.slane %v2414_v11, 3 }
 0x125   : > { %v979_v49 = vsel %vm543_vm1, %v2396_v57, %v978_v35  ;;  %v1002_v52 = vsel %vm555_vm5, %v1001_v37, %v1000_v38  ;;  %v1278_v58 = vsel %vm546_vm2, %v2368_v31, %v1277_v41  ;;  %v1263_v35 = vsel %vm546_vm2, %v2399_v60, %v1262_v20 }
 0x126   : > { %v981_v62 = vsel %vm546_vm2, %v980_v40, %v979_v49  ;;  %v1004_v5 = vsel %vm558_vm6, %v1003_v47, %v1002_v52  ;;  %v1280_v9 = vsel %vm549_vm3, %v1279_v53, %v1278_v58  ;;  %v1564_v37 = vrot.slane %v2373_v36, 7 }
 0x127   : > { %v983_v13 = vsel %vm549_vm3, %v982_v55, %v981_v62  ;;  %v1282_v18 = vsel %vm552_vm4, %v1281_v8, %v1280_v9  ;;  %v1287_v38 = vrot.slane %v2385_v46, 3  ;;  %v1563_v40 = vsel %vm549_vm3, %v2370_v33, %v1562_v22 }
 0x128   : > { %v985_v19 = vsel %vm552_vm4, %v984_v7, %v983_v13  ;;  %v1284_v31 = vsel %vm555_vm5, %v1283_v29, %v1282_v18  ;;  %v1543_v41 = vrot.slane %v2394_v56, 3  ;;  %v1266_v49 = vrot.slane %v2405_v3, 6 }
 0x129   : > { %v987_v30 = vsel %vm555_vm5, %v986_v17, %v985_v19  ;;  %v1286_v47 = vsel %vm558_vm6, %v1285_v21, %v1284_v31  ;;  %v990_v53 = vrot.slane %v2418_v14, 2  ;;  %v1265_v36 = vsel %vm549_vm3, %v1264_v25, %v1263_v35 }
 0x12a   : > { %v1566_v55 = vrot.slane %v2376_v39, 6  ;;  %v989_v56 = vsel %vm558_vm6, %v988_v34, %v987_v30  ;;  %v1546_v58 = vrot.slane %v2399_v60, 1  ;;  %v1268_v62 = vrot.slane %v2408_v6, 5 }
 0x12b   : > { %v1267_v2 = vsel %vm552_vm4, %v1266_v49, %v1265_v36  ;;  %v1568_v39 = vrot.slane %v2381_v43, 5  ;;  %v1270_v7 = vrot.slane %v2414_v11, 4  ;;  %v1549_v13 = vrot.slane %v2405_v3, 7 }
 0x12c   : > { %v1269_v9 = vsel %vm555_vm5, %v1268_v62, %v1267_v2  ;;  %v1551_v18 = vrot.slane %v2408_v6, 6  ;;  %v1553_v19 = vrot.slane %v2414_v11, 5  ;;  %v1555_v6 = vrot.slane %v2418_v14, 4 }
 0x12d   : > { %v1067_v2 = vrot.slane %v2448_v45, 7 }
 0x1b0   : > { %v701_v44 = vpop.xlane.xlu0 %700 }
 0x1b1   : > { %v702_v50 = vsub.f32 %v2441_v32, %v701_v44  ;;  %v1005_v32 = vrot.slane %v2385_v46, 2  ;;  %v1544_v44 = vrot.slane %v2396_v57, 2  ;;  %v1565_v57 = vsel %vm552_vm4, %v1564_v37, %v1563_v40 }
 0x1b2   : > { %v1567_v60 = vsel %vm555_vm5, %v1566_v55, %v1565_v57 }
 0x1b3   : > { %v703_v61 = vmul.f32 1.442695, %v702_v50  ;;  %v1006_v16 = vsel %vm561_vm7, %v1005_v32, %v1004_v5  ;;  %v1545_v0 = vsel %vm543_vm1, %v1544_v44, %v1543_v41  ;;  %v991_v5 = vsel %vm561_vm7, %v990_v53, %v989_v56 }
 0x1b4   : > { %v1007_v23 = vpack.c.b16 %v1006_v16, %v1006_v16  ;;  %v1547_v8 = vsel %vm546_vm2, %v1546_v58, %v1545_v0  ;;  %v992_v43 = vpack.c.b16 %v991_v5, %v991_v5  ;;  %v1569_v12 = vsel %vm558_vm6, %v1568_v39, %v1567_v60 }
 0x1b5   : > { %2204 = vpow2.f32 %v703_v61  ;;  %v1288_v61 = vsel %vm561_vm7, %v1287_v38, %v1286_v47  ;;  %v1548_v29 = vsel %vm549_vm3, %v2402_v63, %v1547_v8  ;;  %v1271_v16 = vsel %vm558_vm6, %v1270_v7, %v1269_v9 }
 0x1b6   : > { %v1012_v52 = vsel %vm651_vm8, %v1007_v23, 0  ;;  %v1289_v32 = vpack.c.b16 %v1288_v61, %v1288_v61  ;;  %v1571_v17 = vsel %vm561_vm7, %v1570_v10, %v1569_v12  ;;  %v1550_v46 = vsel %vm552_vm4, %v1549_v13, %v1548_v29 }
 0x1b7   : > { %v1273_v3 = vsel %vm561_vm7, %v1272_v28, %v1271_v16  ;;  %v1572_v63 = vpack.c.b16 %v1571_v17, %v1571_v17  ;;  %v1552_v20 = vsel %vm555_vm5, %v1551_v18, %v1550_v46  ;;  %v1065_v0 = vrot.slane %v2450_v48, 1 }
 0x1b8   : > { %v1294_v15 = vsel %vm651_vm8, %v1289_v32, 0  ;;  %v1274_v21 = vpack.c.b16 %v1273_v3, %v1273_v3  ;;  %v1554_v23 = vsel %vm558_vm6, %v1553_v19, %v1552_v20  ;;  %v1071_v60 = vrot.slane %v2456_v54, 5 }
 0x1b9   : > { %v1577_v22 = vsel %vm651_vm8, %v1572_v63, 0  ;;  %v1556_v31 = vsel %vm561_vm7, %v1555_v6, %v1554_v23  ;;  %v1066_v39 = vsel %vm543_vm1, %v2446_v42, %v1065_v0  ;;  %v1073_v32 = vrot.slane %v2460_v59, 4 }
 0x1ba   : > { %v1557_v25 = vpack.c.b16 %v1556_v31, %v1556_v31  ;;  %v1068_v5 = vsel %vm546_vm2, %v1067_v2, %v1066_v39  ;;  %v1075_v8 = vrot.slane %v2464_v1, 3  ;;  %v1077_v10 = vrot.slane %v2467_v4, 2 }
 0x1bb   : > { %v1070_v7 = vsel %vm549_vm3, %v1069_v27, %v1068_v5  ;;  %v1348_v16 = vrot.slane %v2446_v42, 1  ;;  %v1351_v18 = vrot.slane %v2453_v51, 7  ;;  %v1630_v3 = vrot.slane %v2450_v48, 3 }
 0x1bc   : > { %v1072_v9 = vsel %vm552_vm4, %v1071_v60, %v1070_v7  ;;  %v1631_v63 = vrot.slane %v2446_v42, 2  ;;  %v1353_v19 = vrot.slane %v2456_v54, 6  ;;  %v1355_v6 = vrot.slane %v2460_v59, 5 }
 0x1bf   : > { %v2538_v50 = vpop.eup %2204 }
 0x1c0   : > { %v708_v33 = vpack.c.bf16 %v2538_v50, %v2538_v50  ;;  %v705_v47 = vsel %vm651_vm8, %v2538_v50, 0.0 }
 0x1c2   : > { %2120 = vmatmul.mubr.msk.bf16.vlgmr.msra.gmra.mrb[0].mxu1 %vm651_vm8, %v708_v33 }
 0x1c3   : > { %2124 = vmatpush3.bf16.xpose.msra.mxu1 %v1012_v52  ;;  %2125 = vmatprep.mubr.msk.bf16.mxu1 %vm2261_vm0, %v2260_v24 }
 0x1c4   : > { %2135 = vmatprep.subr.bf16.mxu1 %v2260_v24 }
 0x1ca   : > { %2126 = vmatmul.mubr.msk.bf16.vlgmr.msra.gmra.mrb[4].mxu1 %vm651_vm8, %v992_v43  ;;  %v1074_v43 = vsel %vm555_vm5, %v1073_v32, %v1072_v9 }
 0x1cb   : > { %2136 = vmatpush3.bf16.xpose.msra.mxu1 %v1294_v15  ;;  %2137 = vmatprep.mubr.msk.bf16.mxu1 %vm2261_vm0, %v2260_v24  ;;  %v1076_v12 = vsel %vm558_vm6, %v1075_v8, %v1074_v43  ;;  %v1347_v15 = vrot.slane %v2450_v48, 2 }
 0x1cc   : > { %2147 = vmatprep.subr.bf16.mxu1 %v2260_v24  ;;  %v1078_v13 = vsel %vm561_vm7, %v1077_v10, %v1076_v12 }
 0x1cd   : > { %v1079_v28 = vpack.c.b16 %v1078_v13, %v1078_v13  ;;  %v1349_v17 = vsel %vm543_vm1, %v1348_v16, %v1347_v15 }
 0x1ce   : > { %v1350_v46 = vsel %vm546_vm2, %v2448_v45, %v1349_v17 }
 0x1cf   : > { %v1084_v29 = vsel %vm799_vm10, %v1079_v28, 0  ;;  %v1352_v20 = vsel %vm549_vm3, %v1351_v18, %v1350_v46  ;;  %v954_v46 = vld [vmem:[%s2685_s30] sm:$0x1] }
 0x1d0   : > { %2130 = vmatpush3.bf16.msra.mxu0 %v1084_v29  ;;  %v1354_v31 = vsel %vm552_vm4, %v1353_v19, %v1352_v20 }
 0x1d1   : > { %2141 = vmatprep.subr.bf16.mxu0 %v2260_v24  ;;  %v1356_v42 = vsel %vm555_vm5, %v1355_v6, %v1354_v31  ;;  %v960_v31 = vld [vmem:[%s2685_s30 + $0x4] sm:$0x1] }
 0x1d2   : > { %2138 = vmatmul.mubr.msk.bf16.vlgmr.msra.gmra.mrb[8].mxu1 %vm651_vm8, %v1274_v21  ;;  %v1633_v21 = vrot.slane %v2448_v45, 1  ;;  %v1359_v45 = vrot.slane %v2467_v4, 3 }
 0x1d3   : > { %2148 = vmatpush3.bf16.xpose.msra.mxu1 %v1577_v22  ;;  %2149 = vmatprep.mubr.msk.bf16.mxu1 %vm2261_vm0, %v2260_v24  ;;  %v1632_v22 = vsel %vm543_vm1, %v1631_v63, %v1630_v3  ;;  %vm1517_vm1 = vsmask.f32 1280 }
 0x1d4   : > { %v1634_v48 = vsel %vm546_vm2, %v1633_v21, %v1632_v22 }
 0x1da   : > { %2150 = vmatmul.mubr.msk.bf16.vlgmr.msra.gmra.mrb[12].mxu1 %vm651_vm8, %v1557_v25 }
 0x295   : > { %v2589_v11 = vpop.f32.mrb[0].mxu1 }
 0x296   : > { %v2121_v30 = vpop.f32.mrb[1].mxu1 }
 0x297   : > { %v840_v34 = vpop.f32.mrb[2].mxu1  ;;  %v1357_v30 = vrot.slane %v2464_v1, 4 }
 0x298   : > { %v2122_v14 = vpop.f32.mrb[3].mxu1 }
 0x29d   : > { %v1048_v35 = vpop.f32.mrb[4].mxu1 }
 0x29e   : > { %v1054_v37 = vsel %vm469_vm9, %v1048_v35, -inf  ;;  %v2127_v38 = vpop.f32.mrb[5].mxu1  ;;  %v1636_v35 = vrot.slane %v2456_v54, 7 }
 0x29f   : > { %v1051_v40 = vpop.f32.mrb[6].mxu1  ;;  %v1055_v41 = vsel %vm651_vm8, %v1054_v37, -inf  ;;  %v1635_v38 = vsel %vm549_vm3, %v2453_v51, %v1634_v48  ;;  %vm1799_vm3 = vsmask.f32 7942 }
 0x2a0   : > { %1056 = vmax.xlane.f32.xlu0 %v1055_v41  ;;  %v2128_v44 = vpop.f32.mrb[7].mxu1  ;;  %v1358_v40 = vsel %vm558_vm6, %v1357_v30, %v1356_v42 }
 0x2a1   : > { %v1637_v44 = vsel %vm552_vm4, %v1636_v35, %v1635_v38  ;;  %v1360_v54 = vsel %vm561_vm7, %v1359_v45, %v1358_v40  ;;  %v969_v35 = vld [vmem:[%s2685_s30 + $0xa] sm:$0x1]  ;;  %v972_v45 = vld [vmem:[%s2685_s30 + $0xc] sm:$0x1] }
 0x2a2   : > { %v1361_v51 = vpack.c.b16 %v1360_v54, %v1360_v54  ;;  %v975_v54 = vld [vmem:[%s2685_s30 + $0xe] sm:$0x1] }
 0x2a4   : > { %706 = vadd.xlane.f32.xlu0 %v705_v47  ;;  %v2262_v47 = vmov 1966171168  }
 0x2a5   : > { %v1330_v49 = vpop.f32.mrb[8].mxu1 }
 0x2a6   : > { %v2600_v52 = vsel %vm469_vm9, %v1330_v49, -inf  ;;  %v2139_v53 = vpop.f32.mrb[9].mxu1  ;;  %v848_v49 = vunpack.c.l.s4 %v2262_v47 }
 0x2a7   : > { %v1333_v36 = vpop.f32.mrb[10].mxu1  ;;  %v1337_v55 = vsel %vm651_vm8, %v2600_v52, -inf }
 0x2a8   : > { %1338 = vmax.xlane.f32.xlu1 %v1337_v55  ;;  %v2140_v33 = vpop.f32.mrb[11].mxu1  ;;  %v1640_v36 = vrot.slane %v2464_v1, 5  ;;  %v1366_v1 = vsel %vm799_vm10, %v1361_v51, 0 }
 0x2ad   : > { %v1613_v56 = vpop.f32.mrb[12].mxu1 }
 0x2ae   : > { %v2607_v57 = vsel %vm469_vm9, %v1613_v56, -inf  ;;  %v2151_v50 = vpop.f32.mrb[13].mxu1  ;;  %v849_v56 = vunpack.c.0.s8 %v848_v49 }
 0x2af   : > { %v1616_v58 = vpop.f32.mrb[14].mxu1  ;;  %v1620_v61 = vsel %vm651_vm8, %v2607_v57, -inf  ;;  %v1642_v50 = vrot.slane %v2467_v4, 4 }
 0x2b0   : > { %1621 = vmax.xlane.f32.xlu1 %v1620_v61  ;;  %v2152_v62 = vpop.f32.mrb[15].mxu1  ;;  %v2263_v61 = vmov 857870592   ;;  %v2661_v5 = vsub.s32 %v849_v56, %v2432_v26 }
 0x2b1   : > { %v888_v62 = vunpack.c.l.s4 %v2263_v61 }
 0x2b3   : > { %v889_v32 = vunpack.c.0.s8 %v888_v62 }
 0x32d   : > { %v1057_v23 = vpop.xlane.xlu0 %1056 }
 0x32e   : > { %v1058_v25 = vsub.f32 %v1054_v37, %v1057_v23  ;;  %v1638_v37 = vrot.slane %v2460_v59, 6  ;;  %v957_v23 = vld [vmem:[%s2685_s30 + $0x2] sm:$0x1] }
 0x330   : > { %v1059_v34 = vmul.f32 1.442695, %v1058_v25  ;;  %v1639_v33 = vsel %vm555_vm5, %v1638_v37, %v1637_v44  ;;  %v966_v25 = vld [vmem:[%s2685_s30 + $0x8] sm:$0x1] }
 0x331   : > { %v707_v14 = vpop.xlane.xlu0 %706  ;;  %v1641_v59 = vsel %vm558_vm6, %v1640_v36, %v1639_v33 }
 0x332   : > { %2206 = vpow2.f32 %v1059_v34  ;;  %v1643_v4 = vsel %vm561_vm7, %v1642_v50, %v1641_v59 }
 0x333   : > { %2208 = vrcp.f32 %v707_v14  ;;  %v1644_v9 = vpack.c.b16 %v1643_v4, %v1643_v4  ;;  %v963_v14 = vld [vmem:[%s2685_s30 + $0x6] sm:$0x1] }
 0x335   : > { %v1339_v41 = vpop.xlane.xlu1 %1338  ;;  %v1649_v29 = vsel %vm799_vm10, %v1644_v9, 0 }
 0x336   : > { %v1340_v53 = vsub.f32 %v2600_v52, %v1339_v41 }
 0x338   : > { %v1341_v55 = vmul.f32 1.442695, %v1340_v53 }
 0x33a   : > { %2210 = vpow2.f32 %v1341_v55 }
 0x33c   : > { %v2207_v58 = vpop.eup %2206 }
 0x33d   : > { %v2209_v0 = vpop.eup %2208  ;;  %v1622_v2 = vpop.xlane.xlu1 %1621  ;;  %v1061_v52 = vsel %vm651_vm8, %v2207_v58, 0.0  ;;  %v1064_v39 = vpack.c.bf16 %v2207_v58, %v2207_v58 }
 0x33e   : > { %v844_v27 = vmul.f32 %v2209_v0, %v2589_v11  ;;  %v1623_v60 = vsub.f32 %v2607_v57, %v1622_v2  ;;  %1062 = vadd.xlane.f32.xlu0 %v1061_v52  ;;  %v2672_v57 = vsub.s32 %v889_v32, %v2432_v26 }
 0x33f   : > { %2132 = vmatmul.mubr.msk.bf16.vlgmr.msra.gmra.mrb[4].mxu0 %vm651_vm8, %v1064_v39 }
 0x340   : > { %v845_v7 = vpack.c.bf16 %v844_v27, %v844_v27  ;;  %v1624_v8 = vmul.f32 1.442695, %v1623_v60  ;;  %2142 = vmatpush3.bf16.msra.mxu0 %v1366_v1  ;;  %2143 = vmatprep.mubr.msk.bf16.mxu0 %vm2261_vm0, %v2260_v24 }
 0x341   : > { %2153 = vmatprep.subr.bf16.mxu0 %v2260_v24 }
 0x342   : > { %v853_v10 = vrot.slane %v845_v7, %v2661_v5  ;;  %2212 = vpow2.f32 %v1624_v8 }
 0x344   : > { %v2211_v11 = vpop.eup %2210  ;;  %v854_v43 = vcombine.high %v853_v10, %v853_v10  ;;  %v861_v12 = vrot.slane %v853_v10, %v2661_v5 }
 0x345   : > { %v1343_v13 = vsel %vm651_vm8, %v2211_v11, 0.0  ;;  %v1346_v28 = vpack.c.bf16 %v2211_v11, %v2211_v11 }
 0x346   : > { %v868_v15 = vrot.slane %v854_v43, %v2661_v5  ;;  %v869_v16 = vcombine.high %v861_v12, %v861_v12  ;;  %v872_v17 = vunpack.i.h.s16 %v861_v12  ;;  %v2069_v18 = vpack.i.b16 %v861_v12, %v861_v12  ;;  %1344 = vadd.xlane.f32.xlu1 %v1343_v13 }
 0x347   : > { %2144 = vmatmul.mubr.msk.bf16.vlgmr.msra.gmra.mrb[8].mxu0 %vm651_vm8, %v1346_v28 }
 0x348   : > { %v870_v3 = vcombine.high %v868_v15, %v868_v15  ;;  %v874_v63 = vunpack.i.h.s16 %v868_v15  ;;  %v876_v19 = vunpack.i.h.s16 %v869_v16  ;;  %v880_v20 = vpack.i.b16 %v872_v17, %v872_v17  ;;  %2154 = vmatpush3.bf16.msra.mxu0 %v1649_v29  ;;  %2155 = vmatprep.mubr.msk.bf16.mxu0 %vm2261_vm0, %v2260_v24 }
 0x349   : > { %v2070_v21 = vpack.i.b16 %v868_v15, %v868_v15  ;;  %v2071_v6 = vpack.i.b16 %v869_v16, %v869_v16  ;;  %v893_v22 = vrot.slane %v2069_v18, %v2672_v57  ;;  %vm1516_vm0 = vcmask 58369  }
 0x34a   : > { %v878_v30 = vunpack.i.h.s16 %v870_v3  ;;  %v882_v48 = vpack.i.b16 %v874_v63, %v874_v63  ;;  %v884_v34 = vpack.i.b16 %v876_v19, %v876_v19  ;;  %v2072_v42 = vpack.i.b16 %v870_v3, %v870_v3  ;;  %vm2784_vm2 = vmand %vm1516_vm0, %vm1517_vm1  ;;  %v1522_v63 = vld [vmem:[%s2685_s30 + $0x2] sm:$0x2] }
 0x34b   : > { %v900_v38 = vrot.slane %v880_v20, %v2672_v57  ;;  %v907_v24 = vrot.slane %v2070_v21, %v2672_v57  ;;  %v921_v40 = vrot.slane %v2071_v6, %v2672_v57  ;;  %v955_v37 = vsel %vm2680_vm13, %v893_v22, %v954_v46  ;;  %vm2832_vm4 = vmand %vm1516_vm0, %vm1799_vm3 }
 0x34c   : > { %v2213_v41 = vpop.eup %2212  ;;  %v886_v44 = vpack.i.b16 %v878_v30, %v878_v30  ;;  %v914_v47 = vrot.slane %v882_v48, %v2672_v57  ;;  %v928_v49 = vrot.slane %v884_v34, %v2672_v57  ;;  %v935_v53 = vrot.slane %v2072_v42, %v2672_v57  ;;  %956 = vst [vmem:[%s2685_s30] sm:$0x1] %v955_v37 }
 0x34d   : > { %v958_v36 = vsel %vm2680_vm13, %v900_v38, %v957_v23  ;;  %v961_v55 = vsel %vm2680_vm13, %v907_v24, %v960_v31  ;;  %v967_v33 = vsel %vm2680_vm13, %v921_v40, %v966_v25  ;;  %v1626_v51 = vsel %vm651_vm8, %v2213_v41, 0.0 }
 0x34e   : > { %v942_v56 = vrot.slane %v886_v44, %v2672_v57  ;;  %v964_v50 = vsel %vm2680_vm13, %v914_v47, %v963_v14  ;;  %v970_v59 = vsel %vm2680_vm13, %v928_v49, %v969_v35  ;;  %v973_v58 = vsel %vm2680_vm13, %v935_v53, %v972_v45  ;;  %959 = vst [vmem:[%s2685_s30 + $0x2] sm:$0x1] %v958_v36 }
 0x34f   : > { %962 = vst [vmem:[%s2685_s30 + $0x4] sm:$0x1] %v961_v55  ;;  %968 = vst [vmem:[%s2685_s30 + $0x8] sm:$0x1] %v967_v33  ;;  %1627 = vadd.xlane.f32.xlu1 %v1626_v51  ;;  %v1629_v61 = vpack.c.bf16 %v2213_v41, %v2213_v41 }
 0x350   : > { %965 = vst [vmem:[%s2685_s30 + $0x6] sm:$0x1] %v964_v50  ;;  %971 = vst [vmem:[%s2685_s30 + $0xa] sm:$0x1] %v970_v59  ;;  %v976_v62 = vsel %vm2680_vm13, %v942_v56, %v975_v54 }
 0x351   : > { %974 = vst [vmem:[%s2685_s30 + $0xc] sm:$0x1] %v973_v58  ;;  %977 = vst [vmem:[%s2685_s30 + $0xe] sm:$0x1] %v976_v62  ;;  %2156 = vmatmul.mubr.msk.bf16.vlgmr.msra.gmra.mrb[12].mxu0 %vm651_vm8, %v1629_v61 }
 0x353   : > { %v1236_v48 = vld [vmem:[%s2685_s30] sm:$0x1] }
 0x355   : > { %v1239_v37 = vld [vmem:[%s2685_s30 + $0x2] sm:$0x1] }
 0x356   : > { %v1242_v41 = vld [vmem:[%s2685_s30 + $0x4] sm:$0x1]  ;;  %v1248_v44 = vld [vmem:[%s2685_s30 + $0x8] sm:$0x1] }
 0x357   : > { %v1245_v53 = vld [vmem:[%s2685_s30 + $0x6] sm:$0x1]  ;;  %v1251_v36 = vld [vmem:[%s2685_s30 + $0xa] sm:$0x1] }
 0x358   : > { %v1254_v55 = vld [vmem:[%s2685_s30 + $0xc] sm:$0x1]  ;;  %v1257_v61 = vld [vmem:[%s2685_s30 + $0xe] sm:$0x1] }
 0x3cb   : > { %v1063_v0 = vpop.xlane.xlu0 %1062 }
 0x3cc   : > { %2214 = vrcp.f32 %v1063_v0 }
 0x3d3   : > { %v1345_v2 = vpop.xlane.xlu1 %1344 }
 0x3d4   : > { %2216 = vrcp.f32 %v1345_v2 }
 0x3d6   : > { %v2215_v52 = vpop.eup %2214 }
 0x3dc   : > { %v1628_v7 = vpop.xlane.xlu1 %1627 }
 0x3dd   : > { %2218 = vrcp.f32 %v1628_v7 }
 0x3de   : > { %v2217_v43 = vpop.eup %2216 }
 0x3e7   : > { %v2219_v58 = vpop.eup %2218 }
 0x412   : > { %v1120_v39 = vpop.f32.mrb[4].mxu0 }
 0x413   : > { %v1127_v1 = vmul.f32 %v2215_v52, %v1120_v39  ;;  %v2133_v27 = vpop.f32.mrb[5].mxu0 }
 0x414   : > { %v1123_v60 = vpop.f32.mrb[6].mxu0 }
 0x415   : > { %v1128_v4 = vpack.c.bf16 %v1127_v1, %v1127_v1  ;;  %v2134_v32 = vpop.f32.mrb[7].mxu0 }
 0x417   : > { %v1136_v8 = vrot.slane %v1128_v4, %v2661_v5 }
 0x419   : > { %v1137_v9 = vcombine.high %v1136_v8, %v1136_v8  ;;  %v1144_v10 = vrot.slane %v1136_v8, %v2661_v5 }
 0x41a   : > { %v1402_v11 = vpop.f32.mrb[8].mxu0 }
 0x41b   : > { %v1151_v12 = vrot.slane %v1137_v9, %v2661_v5  ;;  %v1152_v13 = vcombine.high %v1144_v10, %v1144_v10  ;;  %v1155_v28 = vunpack.i.h.s16 %v1144_v10  ;;  %v2075_v29 = vpack.i.b16 %v1144_v10, %v1144_v10  ;;  %v2145_v15 = vpop.f32.mrb[9].mxu0 }
 0x41c   : > { %v1409_v16 = vmul.f32 %v2217_v43, %v1402_v11  ;;  %v1405_v17 = vpop.f32.mrb[10].mxu0 }
 0x41d   : > { %v1153_v18 = vcombine.high %v1151_v12, %v1151_v12  ;;  %v1157_v26 = vunpack.i.h.s16 %v1151_v12  ;;  %v1159_v46 = vunpack.i.h.s16 %v1152_v13  ;;  %v1163_v3 = vpack.i.b16 %v1155_v28, %v1155_v28  ;;  %v2146_v19 = vpop.f32.mrb[11].mxu0  ;;  %v1519_v28 = vld [vmem:[%s2685_s30] sm:$0x2] }
 0x41e   : > { %v2076_v20 = vpack.i.b16 %v1151_v12, %v1151_v12  ;;  %v2077_v21 = vpack.i.b16 %v1152_v13, %v1152_v13  ;;  %v1176_v6 = vrot.slane %v2075_v29, %v2672_v57  ;;  %v1410_v22 = vpack.c.bf16 %v1409_v16, %v1409_v16  ;;  %v1525_v19 = vld [vmem:[%s2685_s30 + $0x4] sm:$0x2] }
 0x41f   : > { %v1161_v23 = vunpack.i.h.s16 %v1153_v18  ;;  %v1165_v31 = vpack.i.b16 %v1157_v26, %v1157_v26  ;;  %v1167_v25 = vpack.i.b16 %v1159_v46, %v1159_v46  ;;  %v2078_v30 = vpack.i.b16 %v1153_v18, %v1153_v18 }
 0x420   : > { %v1183_v34 = vrot.slane %v1163_v3, %v2672_v57  ;;  %v1190_v42 = vrot.slane %v2076_v20, %v2672_v57  ;;  %v1204_v14 = vrot.slane %v2077_v21, %v2672_v57  ;;  %v1237_v35 = vsel %vm2735_vm15, %v1176_v6, %v1236_v48  ;;  %v1531_v20 = vld [vmem:[%s2685_s30 + $0x8] sm:$0x2] }
 0x421   : > { %v1169_v45 = vpack.i.b16 %v1161_v23, %v1161_v23  ;;  %v1197_v38 = vrot.slane %v1165_v31, %v2672_v57  ;;  %v1211_v24 = vrot.slane %v1167_v25, %v2672_v57  ;;  %v1218_v40 = vrot.slane %v2078_v30, %v2672_v57  ;;  %1238 = vst [vmem:[%s2685_s30] sm:$0x1] %v1237_v35  ;;  %v1528_v31 = vld [vmem:[%s2685_s30 + $0x6] sm:$0x2]  ;;  %v1534_v25 = vld [vmem:[%s2685_s30 + $0xa] sm:$0x2] }
 0x422   : > { %v1240_v47 = vsel %vm2735_vm15, %v1183_v34, %v1239_v37  ;;  %v1243_v49 = vsel %vm2735_vm15, %v1190_v42, %v1242_v41  ;;  %v1249_v54 = vsel %vm2735_vm15, %v1204_v14, %v1248_v44  ;;  %v1418_v33 = vrot.slane %v1410_v22, %v2661_v5  ;;  %v1537_v30 = vld [vmem:[%s2685_s30 + $0xc] sm:$0x2] }
 0x423   : > { %v1225_v51 = vrot.slane %v1169_v45, %v2672_v57  ;;  %1241 = vst [vmem:[%s2685_s30 + $0x2] sm:$0x1] %v1240_v47  ;;  %1244 = vst [vmem:[%s2685_s30 + $0x4] sm:$0x1] %v1243_v49  ;;  %v1246_v56 = vsel %vm2735_vm15, %v1197_v38, %v1245_v53  ;;  %v1252_v50 = vsel %vm2735_vm15, %v1211_v24, %v1251_v36  ;;  %v1540_v24 = vld [vmem:[%s2685_s30 + $0xe] sm:$0x2] }
 0x424   : > { %1250 = vst [vmem:[%s2685_s30 + $0x8] sm:$0x1] %v1249_v54  ;;  %v1255_v59 = vsel %vm2735_vm15, %v1218_v40, %v1254_v55  ;;  %1247 = vst [vmem:[%s2685_s30 + $0x6] sm:$0x1] %v1246_v56  ;;  %v1419_v62 = vcombine.high %v1418_v33, %v1418_v33  ;;  %v1426_v0 = vrot.slane %v1418_v33, %v2661_v5  ;;  %v1685_v2 = vpop.f32.mrb[12].mxu0 }
 0x425   : > { %1253 = vst [vmem:[%s2685_s30 + $0xa] sm:$0x1] %v1252_v50  ;;  %1256 = vst [vmem:[%s2685_s30 + $0xc] sm:$0x1] %v1255_v59  ;;  %v1258_v52 = vsel %vm2735_vm15, %v1225_v51, %v1257_v61  ;;  %v1692_v39 = vmul.f32 %v2219_v58, %v1685_v2  ;;  %v2157_v1 = vpop.f32.mrb[13].mxu0 }
 0x426   : > { %1259 = vst [vmem:[%s2685_s30 + $0xe] sm:$0x1] %v1258_v52  ;;  %v1433_v27 = vrot.slane %v1419_v62, %v2661_v5  ;;  %v1434_v60 = vcombine.high %v1426_v0, %v1426_v0  ;;  %v1437_v4 = vunpack.i.h.s16 %v1426_v0  ;;  %v2081_v32 = vpack.i.b16 %v1426_v0, %v1426_v0  ;;  %v1688_v7 = vpop.f32.mrb[14].mxu0 }
 0x427   : > { %v1693_v8 = vpack.c.bf16 %v1692_v39, %v1692_v39  ;;  %v2158_v9 = vpop.f32.mrb[15].mxu0 }
 0x428   : > { %v1435_v10 = vcombine.high %v1433_v27, %v1433_v27  ;;  %v1439_v11 = vunpack.i.h.s16 %v1433_v27  ;;  %v1441_v43 = vunpack.i.h.s16 %v1434_v60  ;;  %v1445_v12 = vpack.i.b16 %v1437_v4, %v1437_v4 }
 0x429   : > { %v2082_v29 = vpack.i.b16 %v1433_v27, %v1433_v27  ;;  %v2083_v15 = vpack.i.b16 %v1434_v60, %v1434_v60  ;;  %v1458_v16 = vrot.slane %v2081_v32, %v2672_v57  ;;  %v1701_v17 = vrot.slane %v1693_v8, %v2661_v5 }
 0x42a   : > { %v1443_v18 = vunpack.i.h.s16 %v1435_v10  ;;  %v1447_v26 = vpack.i.b16 %v1439_v11, %v1439_v11  ;;  %v1449_v46 = vpack.i.b16 %v1441_v43, %v1441_v43  ;;  %v2084_v3 = vpack.i.b16 %v1435_v10, %v1435_v10 }
 0x42b   : > { %v1465_v21 = vrot.slane %v1445_v12, %v2672_v57  ;;  %v1472_v6 = vrot.slane %v2082_v29, %v2672_v57  ;;  %v1486_v22 = vrot.slane %v2083_v15, %v2672_v57  ;;  %v1520_v23 = vsel %vm2784_vm2, %v1458_v16, %v1519_v28 }
 0x42c   : > { %v1451_v48 = vpack.i.b16 %v1443_v18, %v1443_v18  ;;  %v1479_v34 = vrot.slane %v1447_v26, %v2672_v57  ;;  %v1493_v42 = vrot.slane %v1449_v46, %v2672_v57  ;;  %v1500_v14 = vrot.slane %v2084_v3, %v2672_v57  ;;  %1521 = vst [vmem:[%s2685_s30] sm:$0x2] %v1520_v23 }
 0x42d   : > { %v1523_v35 = vsel %vm2784_vm2, %v1465_v21, %v1522_v63  ;;  %v1526_v45 = vsel %vm2784_vm2, %v1472_v6, %v1525_v19  ;;  %v1532_v38 = vsel %vm2784_vm2, %v1486_v22, %v1531_v20  ;;  %v1702_v40 = vcombine.high %v1701_v17, %v1701_v17 }
 0x42e   : > { %v1507_v37 = vrot.slane %v1451_v48, %v2672_v57  ;;  %1524 = vst [vmem:[%s2685_s30 + $0x2] sm:$0x2] %v1523_v35  ;;  %1527 = vst [vmem:[%s2685_s30 + $0x4] sm:$0x2] %v1526_v45  ;;  %v1529_v41 = vsel %vm2784_vm2, %v1479_v34, %v1528_v31  ;;  %v1535_v44 = vsel %vm2784_vm2, %v1493_v42, %v1534_v25 }
 0x42f   : > { %1533 = vst [vmem:[%s2685_s30 + $0x8] sm:$0x2] %v1532_v38  ;;  %v1538_v47 = vsel %vm2784_vm2, %v1500_v14, %v1537_v30  ;;  %1530 = vst [vmem:[%s2685_s30 + $0x6] sm:$0x2] %v1529_v41  ;;  %v1709_v49 = vrot.slane %v1701_v17, %v2661_v5  ;;  %v1716_v53 = vrot.slane %v1702_v40, %v2661_v5 }
 0x430   : > { %1536 = vst [vmem:[%s2685_s30 + $0xa] sm:$0x2] %v1535_v44  ;;  %1539 = vst [vmem:[%s2685_s30 + $0xc] sm:$0x2] %v1538_v47  ;;  %v1541_v54 = vsel %vm2784_vm2, %v1507_v37, %v1540_v24 }
 0x431   : > { %1542 = vst [vmem:[%s2685_s30 + $0xe] sm:$0x2] %v1541_v54  ;;  %v1717_v36 = vcombine.high %v1709_v49, %v1709_v49  ;;  %v1718_v55 = vcombine.high %v1716_v53, %v1716_v53  ;;  %v1720_v33 = vunpack.i.h.s16 %v1709_v49  ;;  %v1722_v51 = vunpack.i.h.s16 %v1716_v53 }
 0x432   : > { %v2087_v56 = vpack.i.b16 %v1709_v49, %v1709_v49  ;;  %v2088_v50 = vpack.i.b16 %v1716_v53, %v1716_v53 }
 0x433   : > { %v1724_v59 = vunpack.i.h.s16 %v1717_v36  ;;  %v1726_v58 = vunpack.i.h.s16 %v1718_v55  ;;  %v1728_v61 = vpack.i.b16 %v1720_v33, %v1720_v33  ;;  %v1730_v62 = vpack.i.b16 %v1722_v51, %v1722_v51  ;;  %v1801_v0 = vld [vmem:[%s2685_s30] sm:$0x2] }
 0x434   : > { %v2089_v2 = vpack.i.b16 %v1717_v36, %v1717_v36  ;;  %v2090_v52 = vpack.i.b16 %v1718_v55, %v1718_v55  ;;  %v1741_v39 = vrot.slane %v2087_v56, %v2672_v57  ;;  %v1755_v1 = vrot.slane %v2088_v50, %v2672_v57 }
 0x435   : > { %v1732_v27 = vpack.i.b16 %v1724_v59, %v1724_v59  ;;  %v1734_v60 = vpack.i.b16 %v1726_v58, %v1726_v58  ;;  %v1748_v4 = vrot.slane %v1728_v61, %v2672_v57  ;;  %v1762_v32 = vrot.slane %v1730_v62, %v2672_v57  ;;  %v1804_v7 = vld [vmem:[%s2685_s30 + $0x2] sm:$0x2]  ;;  %v1807_v8 = vld [vmem:[%s2685_s30 + $0x4] sm:$0x2]  ;;  %1831 = sbr.rel (!%p2323_p6) target bundleno = 1093 (0x445), region = 159 }
 0x436   : > { %v1813_v9 = vld [vmem:[%s2685_s30 + $0x8] sm:$0x2]  ;;  %v1769_v10 = vrot.slane %v2089_v2, %v2672_v57  ;;  %v1783_v11 = vrot.slane %v2090_v52, %v2672_v57  ;;  %v1802_v43 = vsel %vm2832_vm4, %v1741_v39, %v1801_v0  ;;  %v1808_v12 = vsel %vm2832_vm4, %v1755_v1, %v1807_v8  ;;  %v1810_v13 = vld [vmem:[%s2685_s30 + $0x6] sm:$0x2] }
 0x437   : > { %v1816_v28 = vld [vmem:[%s2685_s30 + $0xa] sm:$0x2]  ;;  %v1819_v29 = vld [vmem:[%s2685_s30 + $0xc] sm:$0x2]  ;;  %v1776_v15 = vrot.slane %v1732_v27, %v2672_v57  ;;  %v1790_v16 = vrot.slane %v1734_v60, %v2672_v57  ;;  %1803 = vst [vmem:[%s2685_s30] sm:$0x2] %v1802_v43  ;;  %v1805_v17 = vsel %vm2832_vm4, %v1748_v4, %v1804_v7  ;;  %v1811_v18 = vsel %vm2832_vm4, %v1762_v32, %v1810_v13 }
 0x438   : > { %1809 = vst [vmem:[%s2685_s30 + $0x4] sm:$0x2] %v1808_v12  ;;  %1806 = vst [vmem:[%s2685_s30 + $0x2] sm:$0x2] %v1805_v17  ;;  %v1814_v26 = vsel %vm2832_vm4, %v1769_v10, %v1813_v9  ;;  %v1820_v46 = vsel %vm2832_vm4, %v1783_v11, %v1819_v29  ;;  %v1822_v3 = vld [vmem:[%s2685_s30 + $0xe] sm:$0x2] }
 0x439   : > { %1812 = vst [vmem:[%s2685_s30 + $0x6] sm:$0x2] %v1811_v18  ;;  %1815 = vst [vmem:[%s2685_s30 + $0x8] sm:$0x2] %v1814_v26  ;;  %v1817_v57 = vsel %vm2832_vm4, %v1776_v15, %v1816_v28  ;;  %v1823_v63 = vsel %vm2832_vm4, %v1790_v16, %v1822_v3 }
 0x43a   : > { %1821 = vst [vmem:[%s2685_s30 + $0xc] sm:$0x2] %v1820_v46  ;;  %1818 = vst [vmem:[%s2685_s30 + $0xa] sm:$0x2] %v1817_v57 }
 0x43b   : > { %1824 = vst [vmem:[%s2685_s30 + $0xe] sm:$0x2] %v1823_v63 }
 0x43e   : > { %v1850_v19 = vld [vmem:[%s2685_s30] sm:$0x3] }
 0x43f   : > { %v1852_v20 = vld [vmem:[%s2685_s30 + $0x2] sm:$0x3]  ;;  %v1854_v21 = vld [vmem:[%s2685_s30 + $0x4] sm:$0x3]  ;;  %1851 = vst [vmem:[%s1834_s7] sm:$0x3] %v1850_v19 }
 0x440   : > { %v1856_v6 = vld [vmem:[%s2685_s30 + $0x6] sm:$0x3]  ;;  %v1858_v22 = vld [vmem:[%s2685_s30 + $0x8] sm:$0x3]  ;;  %1853 = vst [vmem:[%s1834_s7 + $0x4] sm:$0x3] %v1852_v20 }
 0x441   : > { %1855 = vst [vmem:[%s1834_s7 + $0x8] sm:$0x3] %v1854_v21  ;;  %1857 = vst [vmem:[%s1834_s7 + $0xc] sm:$0x3] %v1856_v6  ;;  %v1860_v23 = vld [vmem:[%s2685_s30 + $0xa] sm:$0x3] }
 0x442   : > { %1859 = vst [vmem:[%s1834_s7 + $0x10] sm:$0x3] %v1858_v22  ;;  %v1862_v31 = vld [vmem:[%s2685_s30 + $0xc] sm:$0x3]  ;;  %v1864_v25 = vld [vmem:[%s2685_s30 + $0xe] sm:$0x3] }
 0x443   : > { %1861 = vst [vmem:[%s1834_s7 + $0x14] sm:$0x3] %v1860_v23  ;;  %1863 = vst [vmem:[%s1834_s7 + $0x18] sm:$0x3] %v1862_v31 }
 0x444   : > { %1865 = vst [vmem:[%s1834_s7 + $0x1c] sm:$0x3] %v1864_v25 }
 0x445 PF: > { %s13_s16 = sadd.s32 1, %s2258_s16   ;;  %s2919_s12 = smov %s2246_s13 }
 0x446   : > { %p10_p11 = scmp.ge.s32.totalorder %s13_s16, 4   ;;  %s2920_s13 = smov %s2328_s23 }
 0x447   : > { %s2921_s14 = smov %s2254_s15  ;;  %s2922_s15 = smov %s2924_s17 }
 0x448   :  { %12 = sbr.rel (!%p10_p11) target bundleno = 3 (0x3), region = 247 }

</bundles_post_ra>
